<compile_context>
chip_gen: v6e
topology: v6e:2x2x1
jax: 0.10.0
libtpu: 0.0.40
codegen_flags: <defaults>
</compile_context>

<pallas_src>
import functools

import jax
import jax.numpy as jnp
from jax import lax
from jax.experimental import pallas as pl
from jax.experimental.pallas import tpu as pltpu

LEAKY_SLOPE = 0.01  # nn.LeakyReLU default negative_slope
CPAD = 8            # input channels padded to one sublane group


def _pick_tile(n, target):
    """Largest divisor of n that is a multiple of 128 and <= target (else n)."""
    if n <= target:
        return n
    t = (min(target, n) // 128) * 128
    for cand in range(t, 0, -128):
        if n % cand == 0:
            return cand
    # TODO(synk): masked ragged last-tile handling for HW with no 128-multiple divisor
    return n


def _bf16_eup_ok():
    """bf16 transcendentals are available on v6e/v7x but not v5e."""
    try:
        kind = jax.devices()[0].device_kind.lower()
        return ("v6" in kind) or ("v7" in kind) or ("7x" in kind)
    except Exception:
        return False


# ----------------------------------------------------------------------------
# Kernel 1: fused head — encoder 1x1 conv + LeakyReLU, decoder 1x1 conv ->
# sigmoid map + cross-tile global max, proj_head (conv1x1 -> LeakyReLU ->
# conv1x1).  Layout: channels on sublanes, HW on lanes.  Grid = (B, HW/THW),
# HW axis innermost / "arbitrary" so the map_pred max block stays resident.
# ----------------------------------------------------------------------------
def _head_kernel(x_ref, ew_ref, eb_ref, dw_ref, db_ref,
                 w1_ref, b1_ref, w2_ref, b2_ref,
                 map_ref, mpred_ref, f1t_ref):
    j = pl.program_id(1)
    x = x_ref[0]                                                  # (CPAD, THW)

    # encoder block: featT = LeakyReLU(W_enc @ x + b)             (fc, THW)
    featT = jnp.dot(ew_ref[...], x, preferred_element_type=jnp.float32) + eb_ref[...]
    featT = jnp.where(featT > 0, featT, LEAKY_SLOPE * featT)

    # decoder: C->1 projection as VPU multiply + sublane reduce (lane-dense)
    logits = jnp.sum(featT * dw_ref[...], axis=0, keepdims=True) + db_ref[...]
    m = jax.nn.sigmoid(logits)                                    # (1, THW)
    map_ref[0] = m

    tile_max = jnp.max(m)

    @pl.when(j == 0)
    def _():
        mpred_ref[...] = jnp.full_like(mpred_ref, -jnp.inf)

    mpred_ref[...] = jnp.maximum(mpred_ref[...], tile_max)

    # proj_head1: conv1x1 -> LeakyReLU -> conv1x1, still lane-dense on HW
    h = jnp.dot(w1_ref[...], featT, preferred_element_type=jnp.float32) + b1_ref[...]
    h = jnp.where(h > 0, h, LEAKY_SLOPE * h)
    f1t = jnp.dot(w2_ref[...], h, preferred_element_type=jnp.float32) + b2_ref[...]
    f1t_ref[0] = f1t.astype(f1t_ref.dtype)                        # bf16 (C_out, THW)


def head_call(x_pad, enc_w, enc_b, dec_w, dec_b, w1, b1, w2, b2, *, thw):
    B, Cp, HW = x_pad.shape
    fc = enc_w.shape[0]
    cvo = w2.shape[0]
    assert HW % thw == 0
    nhw = HW // thw
    return pl.pallas_call(
        _head_kernel,
        out_shape=(jax.ShapeDtypeStruct((B, 1, HW), jnp.float32),      # sigmoid map
                   jax.ShapeDtypeStruct((B, 1, 128), jnp.float32),     # map_pred
                   jax.ShapeDtypeStruct((B, cvo, HW), jnp.bfloat16)),  # f1^T
        grid=(B, nhw),
        in_specs=[pl.BlockSpec((1, Cp, thw), lambda i, j: (i, 0, j)),
                  pl.BlockSpec((fc, Cp), lambda i, j: (0, 0)),
                  pl.BlockSpec((fc, 1), lambda i, j: (0, 0)),
                  pl.BlockSpec((fc, 1), lambda i, j: (0, 0)),
                  pl.BlockSpec((1, 1), lambda i, j: (0, 0)),
                  pl.BlockSpec((fc, fc), lambda i, j: (0, 0)),
                  pl.BlockSpec((fc, 1), lambda i, j: (0, 0)),
                  pl.BlockSpec((cvo, fc), lambda i, j: (0, 0)),
                  pl.BlockSpec((cvo, 1), lambda i, j: (0, 0))],
        out_specs=(pl.BlockSpec((1, 1, thw), lambda i, j: (i, 0, j)),
                   pl.BlockSpec((1, 1, 128), lambda i, j: (i, 0, 0)),  # resident max
                   pl.BlockSpec((1, cvo, thw), lambda i, j: (i, 0, j))),
        compiler_params=pltpu.CompilerParams(
            dimension_semantics=("parallel", "arbitrary")),
    )(x_pad, enc_w, enc_b, dec_w, dec_b, w1, b1, w2, b2)


# ----------------------------------------------------------------------------
# Kernel 2: tiled consistency volume  v = sigmoid(-(f f^T)/scale)  (== 1-sigmoid)
# plus cross-tile global max.  Grid = (B, HW/TQ, HW/TK), k innermost/arbitrary.
# Both tiles are loaded straight from f1^T (C, HW); the C contraction is a
# transposed-LHS matmul.  bf16 MXU operands, f32 accumulation, bf16 output.
# ----------------------------------------------------------------------------
def _volume_kernel(fq_ref, fk_ref, vol_ref, pred_ref, *, inv_scale, sigmoid_in_bf16):
    ki = pl.program_id(2)
    # (C, TQ)^T @ (C, TK) -> (TQ, TK), f32 accumulation
    v = lax.dot_general(fq_ref[0], fk_ref[0],
                        dimension_numbers=(((0,), (0,)), ((), ())),
                        preferred_element_type=jnp.float32)
    z = v * (-inv_scale)                        # == -(v / scale)
    if sigmoid_in_bf16:                         # bf16 EUP (v6e/v7x only)
        z = z.astype(jnp.bfloat16)
    s = jax.nn.sigmoid(z)                       # == 1 - sigmoid(v / scale)
    vol_ref[0] = s.astype(vol_ref.dtype)        # bf16 store (halves HBM writeback)

    tmax = jnp.max(s.astype(jnp.float32))

    @pl.when(ki == 0)
    def _():
        pred_ref[...] = jnp.full_like(pred_ref, -jnp.inf)

    pred_ref[...] = jnp.maximum(pred_ref[...], tmax)


def volume_call(f1t, scale, *, tq, tk, sigmoid_in_bf16):
    B, C, HW = f1t.shape
    assert HW % tq == 0 and HW % tk == 0
    nq, nk = HW // tq, HW // tk
    return pl.pallas_call(
        functools.partial(_volume_kernel, inv_scale=1.0 / scale,
                          sigmoid_in_bf16=sigmoid_in_bf16),
        out_shape=(jax.ShapeDtypeStruct((B, HW, HW), jnp.bfloat16),
                   jax.ShapeDtypeStruct((B, nq, 8, 128), jnp.float32)),  # per-q-tile max
        grid=(B, nq, nk),
        in_specs=[pl.BlockSpec((1, C, tq), lambda b, qi, ki: (b, 0, qi)),
                  pl.BlockSpec((1, C, tk), lambda b, qi, ki: (b, 0, ki))],
        out_specs=(pl.BlockSpec((1, tq, tk), lambda b, qi, ki: (b, qi, ki)),
                   pl.BlockSpec((1, 1, 8, 128), lambda b, qi, ki: (b, qi, 0, 0))),
        compiler_params=pltpu.CompilerParams(
            dimension_semantics=("parallel", "parallel", "arbitrary")),
    )(f1t, f1t)


# ----------------------------------------------------------------------------
# Params + model glue (plain JAX: reshapes, channel pad, dict)
# ----------------------------------------------------------------------------
def init_params(key, img_c, fc_dim, vol_in, vol_out):
    assert vol_in == fc_dim, "volume_block_idx=3 implies vol_in == fc_dim"
    ks = jax.random.split(key, 8)
    s = 0.1
    enc_w = s * jax.random.normal(ks[0], (fc_dim, img_c), jnp.float32)
    enc_w = jnp.pad(enc_w, ((0, 0), (0, CPAD - img_c)))      # zero-pad K to 8
    return {
        'enc_w': enc_w,                                                      # (fc, 8)
        'enc_b': s * jax.random.normal(ks[1], (fc_dim, 1), jnp.float32),
        'dec_w': s * jax.random.normal(ks[2], (fc_dim, 1), jnp.float32),
        'dec_b': s * jax.random.normal(ks[3], (1, 1), jnp.float32),
        'ph_w1': s * jax.random.normal(ks[4], (vol_in, vol_in), jnp.float32),
        'ph_b1': s * jax.random.normal(ks[5], (vol_in, 1), jnp.float32),
        'ph_w2': s * jax.random.normal(ks[6], (vol_out, vol_in), jnp.float32),
        'ph_b2': s * jax.random.normal(ks[7], (vol_out, 1), jnp.float32),
    }


def main_model_forward(image, params, *, volume_block_idx, scale,
                       head_tile_target=8192, vol_tile_target=512,
                       sigmoid_in_bf16=False):
    del volume_block_idx  # synthetic encoder blocks are identical copies
    B, Cimg, H, W = image.shape
    HW = H * W

    # NCHW -> (B, C, HW), pad channels to one sublane group (zeros are exact)
    x = image.reshape(B, Cimg, HW)
    x_pad = jnp.pad(x, ((0, 0), (0, CPAD - Cimg), (0, 0)))

    # fused head: encoder feat stays in VMEM; outputs lane-dense map and f1^T
    thw = _pick_tile(HW, head_tile_target)
    out_map_flat, mpred_raw, f1t = head_call(
        x_pad, params['enc_w'], params['enc_b'], params['dec_w'], params['dec_b'],
        params['ph_w1'], params['ph_b1'], params['ph_w2'], params['ph_b2'], thw=thw)

    out_map = out_map_flat.reshape(B, 1, H, W)                 # NCHW, no transpose
    map_pred = mpred_raw[:, 0, 0]                              # (B,)  (map_portion==0)

    # consistency volume (share_embed_head=True -> feature_map2 == feature_map1)
    # bf16 output; LHS/RHS both read straight from f1^T (no wrapper transpose).
    tile = _pick_tile(HW, vol_tile_target)
    vol, pred_part = volume_call(f1t, scale, tq=tile, tk=tile,
                                 sigmoid_in_bf16=sigmoid_in_bf16)
    out_vol = vol.reshape(B, H, W, H, W)
    vol_pred = jnp.max(pred_part, axis=(1, 2, 3))              # finalize cross-tile max

    # TODO(synk): use_gem / use_gsm / otsu_sel / map_portion>0 / seg_size branches
    # (sorting, L1-ball projection, Otsu data-dependent loop, bilinear resize)
    # are not exercised under the chosen default config and are omitted.
    return {'out_map': out_map, 'map_pred': map_pred,
            'out_vol': out_vol, 'vol_pred': vol_pred}


# ----------------------------------------------------------------------------
# Pure-JAX reference (f32) for correctness checking
# ----------------------------------------------------------------------------
def reference_forward(image, params, scale):
    B, Cimg, H, W = image.shape
    HW = H * W
    x = jnp.pad(image.reshape(B, Cimg, HW), ((0, 0), (0, CPAD - Cimg), (0, 0)))
    featT = jnp.einsum('oc,bch->boh', params['enc_w'], x,
                       precision='highest') + params['enc_b'][None]
    featT = jnp.where(featT > 0, featT, LEAKY_SLOPE * featT)
    logits = jnp.einsum('o,boh->bh', params['dec_w'][:, 0], featT,
                        precision='highest') + params['dec_b'][0, 0]
    m = jax.nn.sigmoid(logits)
    h = jnp.einsum('oc,bch->boh', params['ph_w1'], featT,
                   precision='highest') + params['ph_b1'][None]
    h = jnp.where(h > 0, h, LEAKY_SLOPE * h)
    f1t = jnp.einsum('oc,bch->boh', params['ph_w2'], h,
                     precision='highest') + params['ph_b2'][None]
    v = jnp.einsum('bcq,bck->bqk', f1t, f1t, precision='highest') / scale
    vol = 1.0 - jax.nn.sigmoid(v)
    return {'out_map': m.reshape(B, 1, H, W),
            'map_pred': jnp.max(m, axis=1),
            'out_vol': vol.reshape(B, H, W, H, W),
            'vol_pred': jnp.max(vol.reshape(B, -1), axis=1)}


if __name__ == "__main__":
    B, C, H, W = 2, 3, 16, 16
    fc_dim = 32
    volume_block_idx = 3
    vol_in = int(fc_dim * 2 ** (volume_block_idx - 3))   # 32
    vol_out = vol_in // 2                                # 16
    scale = vol_out ** 0.5                               # 4.0

    key = jax.random.PRNGKey(0)
    k_img, k_par = jax.random.split(key)
    image = jax.random.normal(k_img, (B, C, H, W), jnp.float32)
    params = init_params(k_par, C, fc_dim, vol_in, vol_out)

    fwd = jax.jit(functools.partial(main_model_forward,
                                    volume_block_idx=volume_block_idx,
                                    scale=scale,
                                    head_tile_target=8192,
                                    vol_tile_target=512,
                                    sigmoid_in_bf16=_bf16_eup_ok()))
    out = jax.block_until_ready(fwd(image, params))

    assert out['out_map'].shape == (B, 1, H, W)
    assert out['map_pred'].shape == (B,)
    assert out['out_vol'].shape == (B, H, W, H, W)
    assert out['vol_pred'].shape == (B,)
    assert out['out_vol'].dtype == jnp.bfloat16          # HBM-write-bound -> bf16 store

    ref = reference_forward(image, params, scale)
    _d = lambda a, b: float(jnp.max(jnp.abs(a.astype(jnp.float32) - b)))
    assert _d(out['out_map'], ref['out_map']) < 5e-3
    assert _d(out['map_pred'], ref['map_pred']) < 5e-3
    assert _d(out['out_vol'], ref['out_vol']) < 2e-2      # bf16 MXU operands + bf16 store
    assert _d(out['vol_pred'], ref['vol_pred']) < 2e-2
    assert bool(jnp.all(jnp.isfinite(out['out_vol'].astype(jnp.float32))))

    print("KERNEL_OK")
</pallas_src>

<mosaic_0001>
module attributes {stable_mosaic.version = 11 : i64} {
  func.func @_head_kernel(%arg0: i32, %arg1: i32, %arg2: memref<1x8x256xf32, #tpu.memory_space<vmem>>, %arg3: memref<32x8xf32, #tpu.memory_space<vmem>>, %arg4: memref<32x1xf32, #tpu.memory_space<vmem>>, %arg5: memref<32x1xf32, #tpu.memory_space<vmem>>, %arg6: memref<1x1xf32, #tpu.memory_space<vmem>>, %arg7: memref<32x32xf32, #tpu.memory_space<vmem>>, %arg8: memref<32x1xf32, #tpu.memory_space<vmem>>, %arg9: memref<16x32xf32, #tpu.memory_space<vmem>>, %arg10: memref<16x1xf32, #tpu.memory_space<vmem>>, %arg11: memref<1x1x256xf32, #tpu.memory_space<vmem>>, %arg12: memref<1x1x128xf32, #tpu.memory_space<vmem>>, %arg13: memref<1x16x256xbf16, #tpu.memory_space<vmem>>) attributes {dimension_semantics = [#tpu.dimension_semantics<parallel>, #tpu.dimension_semantics<arbitrary>], iteration_bounds = array<i64: 2, 1>, scalar_prefetch = 0 : i64, scratch_operands = 0 : i64, tpu.core_type = #tpu.core_type<tc>, window_params = [{transform_indices = @transform_0, window_bounds = array<i64: 1, 8, 256>}, {pipeline_mode = #tpu.pipeline_mode<synchronous>, transform_indices = @transform_1, window_bounds = array<i64: 32, 8>}, {pipeline_mode = #tpu.pipeline_mode<synchronous>, transform_indices = @transform_2, window_bounds = array<i64: 32, 1>}, {pipeline_mode = #tpu.pipeline_mode<synchronous>, transform_indices = @transform_3, window_bounds = array<i64: 32, 1>}, {pipeline_mode = #tpu.pipeline_mode<synchronous>, transform_indices = @transform_4, window_bounds = array<i64: 1, 1>}, {pipeline_mode = #tpu.pipeline_mode<synchronous>, transform_indices = @transform_5, window_bounds = array<i64: 32, 32>}, {pipeline_mode = #tpu.pipeline_mode<synchronous>, transform_indices = @transform_6, window_bounds = array<i64: 32, 1>}, {pipeline_mode = #tpu.pipeline_mode<synchronous>, transform_indices = @transform_7, window_bounds = array<i64: 16, 32>}, {pipeline_mode = #tpu.pipeline_mode<synchronous>, transform_indices = @transform_8, window_bounds = array<i64: 16, 1>}, {transform_indices = @transform_9, window_bounds = array<i64: 1, 1, 256>}, {transform_indices = @transform_10, window_bounds = array<i64: 1, 1, 128>}, {transform_indices = @transform_11, window_bounds = array<i64: 1, 16, 256>}]} {
    %c0 = arith.constant 0 : index
    %c0_0 = arith.constant 0 : index
    %c0_1 = arith.constant 0 : index
    %0 = vector.load %arg2[%c0, %c0_0, %c0_1] : memref<1x8x256xf32, #tpu.memory_space<vmem>>, vector<1x8x256xf32>
    %1 = vector.shape_cast %0 : vector<1x8x256xf32> to vector<8x256xf32>
    %c0_2 = arith.constant 0 : index
    %c0_3 = arith.constant 0 : index
    %2 = vector.load %arg3[%c0_2, %c0_3] : memref<32x8xf32, #tpu.memory_space<vmem>>, vector<32x8xf32>
    %cst = arith.constant dense<0.000000e+00> : vector<32x256xf32>
    %3 = tpu.matmul %2, %1, %cst {dimension_numbers = #tpu.dot_dimension_numbers<[1], [0], [0], [1], [0, 0, 1, 1], [], []>} : vector<32x8xf32>, vector<8x256xf32>, vector<32x256xf32> -> vector<32x256xf32>
    %c0_4 = arith.constant 0 : index
    %c0_5 = arith.constant 0 : index
    %4 = vector.load %arg4[%c0_4, %c0_5] : memref<32x1xf32, #tpu.memory_space<vmem>>, vector<32x1xf32>
    %5 = vector.broadcast %4 : vector<32x1xf32> to vector<32x256xf32>
    %6 = arith.addf %3, %5 : vector<32x256xf32>
    %cst_6 = arith.constant 0.000000e+00 : f32
    %7 = vector.broadcast %cst_6 : f32 to vector<32x256xf32>
    %8 = arith.cmpf ogt, %6, %7 : vector<32x256xf32>
    %cst_7 = arith.constant 0.00999999977 : f32
    %9 = vector.broadcast %cst_7 : f32 to vector<32x256xf32>
    %10 = arith.mulf %9, %6 : vector<32x256xf32>
    %11 = arith.select %8, %6, %10 : vector<32x256xi1>, vector<32x256xf32>
    %c0_8 = arith.constant 0 : index
    %c0_9 = arith.constant 0 : index
    %12 = vector.load %arg5[%c0_8, %c0_9] : memref<32x1xf32, #tpu.memory_space<vmem>>, vector<32x1xf32>
    %13 = vector.broadcast %12 : vector<32x1xf32> to vector<32x256xf32>
    %14 = arith.mulf %11, %13 : vector<32x256xf32>
    %cst_10 = arith.constant dense<0.000000e+00> : vector<256xf32>
    %15 = vector.multi_reduction <add>, %14, %cst_10 [0] : vector<32x256xf32> to vector<256xf32>
    %16 = vector.shape_cast %15 : vector<256xf32> to vector<1x256xf32>
    %c0_11 = arith.constant 0 : index
    %c0_12 = arith.constant 0 : index
    %17 = vector.load %arg6[%c0_11, %c0_12] : memref<1x1xf32, #tpu.memory_space<vmem>>, vector<1x1xf32>
    %18 = vector.broadcast %17 : vector<1x1xf32> to vector<1x256xf32>
    %19 = arith.addf %16, %18 : vector<1x256xf32>
    %20 = arith.negf %19 : vector<1x256xf32>
    %21 = math.exp %20 : vector<1x256xf32>
    %cst_13 = arith.constant 1.000000e+00 : f32
    %22 = vector.broadcast %cst_13 : f32 to vector<1x256xf32>
    %23 = arith.addf %22, %21 : vector<1x256xf32>
    %24 = arith.divf %22, %23 : vector<1x256xf32>
    %c0_14 = arith.constant 0 : index
    %c0_15 = arith.constant 0 : index
    %c0_16 = arith.constant 0 : index
    %25 = vector.load %arg11[%c0_14, %c0_15, %c0_16] : memref<1x1x256xf32, #tpu.memory_space<vmem>>, vector<1x1x256xf32>
    %26 = vector.shape_cast %25 : vector<1x1x256xf32> to vector<1x256xf32>
    %27 = vector.shape_cast %24 : vector<1x256xf32> to vector<1x1x256xf32>
    tpu.vector_store %arg11[%c0_14, %c0_15, %c0_16], %27 {strides = array<i32>} : memref<1x1x256xf32, #tpu.memory_space<vmem>>, vector<1x1x256xf32>,
    %28 = vector.shape_cast %24 : vector<1x256xf32> to vector<1x1x256xf32>
    %cst_17 = arith.constant dense<0xFF800000> : vector<1xf32>
    %29 = vector.multi_reduction <maximumf>, %28, %cst_17 [1, 2] : vector<1x1x256xf32> to vector<1xf32>
    %30 = vector.shape_cast %29 : vector<1xf32> to vector<1x1x1xf32>
    %31 = vector.extract %30[0, 0, 0] : f32 from vector<1x1x1xf32>
    %c0_i32 = arith.constant 0 : i32
    %32 = arith.cmpi eq, %arg1, %c0_i32 : i32
    %33 = arith.extui %32 : i1 to i32
    %c0_i32_18 = arith.constant 0 : i32
    %34 = arith.cmpi ne, %33, %c0_i32_18 : i32
    scf.if %34 {
      %cst_40 = arith.constant 0xFF800000 : f32
      %58 = vector.broadcast %cst_40 : f32 to vector<1x1x128xf32>
      %c0_41 = arith.constant 0 : index
      %c0_42 = arith.constant 0 : index
      %c0_43 = arith.constant 0 : index
      %59 = vector.load %arg12[%c0_41, %c0_42, %c0_43] : memref<1x1x128xf32, #tpu.memory_space<vmem>>, vector<1x1x128xf32>
      tpu.vector_store %arg12[%c0_41, %c0_42, %c0_43], %58 {strides = array<i32>} : memref<1x1x128xf32, #tpu.memory_space<vmem>>, vector<1x1x128xf32>,
    } else {
    }
    %c0_19 = arith.constant 0 : index
    %c0_20 = arith.constant 0 : index
    %c0_21 = arith.constant 0 : index
    %35 = vector.load %arg12[%c0_19, %c0_20, %c0_21] : memref<1x1x128xf32, #tpu.memory_space<vmem>>, vector<1x1x128xf32>
    %36 = vector.broadcast %31 : f32 to vector<1x1x128xf32>
    %37 = arith.maximumf %35, %36 : vector<1x1x128xf32>
    %c0_22 = arith.constant 0 : index
    %c0_23 = arith.constant 0 : index
    %c0_24 = arith.constant 0 : index
    %38 = vector.load %arg12[%c0_22, %c0_23, %c0_24] : memref<1x1x128xf32, #tpu.memory_space<vmem>>, vector<1x1x128xf32>
    tpu.vector_store %arg12[%c0_22, %c0_23, %c0_24], %37 {strides = array<i32>} : memref<1x1x128xf32, #tpu.memory_space<vmem>>, vector<1x1x128xf32>,
    %c0_25 = arith.constant 0 : index
    %c0_26 = arith.constant 0 : index
    %39 = vector.load %arg7[%c0_25, %c0_26] : memref<32x32xf32, #tpu.memory_space<vmem>>, vector<32x32xf32>
    %cst_27 = arith.constant dense<0.000000e+00> : vector<32x256xf32>
    %40 = tpu.matmul %39, %11, %cst_27 {dimension_numbers = #tpu.dot_dimension_numbers<[1], [0], [0], [1], [0, 0, 1, 1], [], []>} : vector<32x32xf32>, vector<32x256xf32>, vector<32x256xf32> -> vector<32x256xf32>
    %c0_28 = arith.constant 0 : index
    %c0_29 = arith.constant 0 : index
    %41 = vector.load %arg8[%c0_28, %c0_29] : memref<32x1xf32, #tpu.memory_space<vmem>>, vector<32x1xf32>
    %42 = vector.broadcast %41 : vector<32x1xf32> to vector<32x256xf32>
    %43 = arith.addf %40, %42 : vector<32x256xf32>
    %cst_30 = arith.constant 0.000000e+00 : f32
    %44 = vector.broadcast %cst_30 : f32 to vector<32x256xf32>
    %45 = arith.cmpf ogt, %43, %44 : vector<32x256xf32>
    %cst_31 = arith.constant 0.00999999977 : f32
    %46 = vector.broadcast %cst_31 : f32 to vector<32x256xf32>
    %47 = arith.mulf %46, %43 : vector<32x256xf32>
    %48 = arith.select %45, %43, %47 : vector<32x256xi1>, vector<32x256xf32>
    %c0_32 = arith.constant 0 : index
    %c0_33 = arith.constant 0 : index
    %49 = vector.load %arg9[%c0_32, %c0_33] : memref<16x32xf32, #tpu.memory_space<vmem>>, vector<16x32xf32>
    %cst_34 = arith.constant dense<0.000000e+00> : vector<16x256xf32>
    %50 = tpu.matmul %49, %48, %cst_34 {dimension_numbers = #tpu.dot_dimension_numbers<[1], [0], [0], [1], [0, 0, 1, 1], [], []>} : vector<16x32xf32>, vector<32x256xf32>, vector<16x256xf32> -> vector<16x256xf32>
    %c0_35 = arith.constant 0 : index
    %c0_36 = arith.constant 0 : index
    %51 = vector.load %arg10[%c0_35, %c0_36] : memref<16x1xf32, #tpu.memory_space<vmem>>, vector<16x1xf32>
    %52 = vector.broadcast %51 : vector<16x1xf32> to vector<16x256xf32>
    %53 = arith.addf %50, %52 : vector<16x256xf32>
    %54 = arith.truncf %53 : vector<16x256xf32> to vector<16x256xbf16>
    %c0_37 = arith.constant 0 : index
    %c0_38 = arith.constant 0 : index
    %c0_39 = arith.constant 0 : index
    %55 = vector.load %arg13[%c0_37, %c0_38, %c0_39] : memref<1x16x256xbf16, #tpu.memory_space<vmem>>, vector<1x16x256xbf16>
    %56 = vector.shape_cast %55 : vector<1x16x256xbf16> to vector<16x256xbf16>
    %57 = vector.shape_cast %54 : vector<16x256xbf16> to vector<1x16x256xbf16>
    tpu.vector_store %arg13[%c0_37, %c0_38, %c0_39], %57 {strides = array<i32>} : memref<1x16x256xbf16, #tpu.memory_space<vmem>>, vector<1x16x256xbf16>,
    return
  }
  func.func @transform_0(%arg0: i32, %arg1: i32) -> (i32, i32, i32) {
    %c0_i32 = arith.constant 0 : i32
    %c0_i32_0 = arith.constant 0 : i32
    return %arg0, %c0_i32, %arg1 : i32, i32, i32
  }
  func.func @transform_1(%arg0: i32, %arg1: i32) -> (i32, i32) {
    %c0_i32 = arith.constant 0 : i32
    %c0_i32_0 = arith.constant 0 : i32
    %c0_i32_1 = arith.constant 0 : i32
    return %c0_i32, %c0_i32_0 : i32, i32
  }
  func.func @transform_2(%arg0: i32, %arg1: i32) -> (i32, i32) {
    %c0_i32 = arith.constant 0 : i32
    %c0_i32_0 = arith.constant 0 : i32
    %c0_i32_1 = arith.constant 0 : i32
    return %c0_i32, %c0_i32_0 : i32, i32
  }
  func.func @transform_3(%arg0: i32, %arg1: i32) -> (i32, i32) {
    %c0_i32 = arith.constant 0 : i32
    %c0_i32_0 = arith.constant 0 : i32
    %c0_i32_1 = arith.constant 0 : i32
    return %c0_i32, %c0_i32_0 : i32, i32
  }
  func.func @transform_4(%arg0: i32, %arg1: i32) -> (i32, i32) {
    %c0_i32 = arith.constant 0 : i32
    %c0_i32_0 = arith.constant 0 : i32
    %c0_i32_1 = arith.constant 0 : i32
    return %c0_i32, %c0_i32_0 : i32, i32
  }
  func.func @transform_5(%arg0: i32, %arg1: i32) -> (i32, i32) {
    %c0_i32 = arith.constant 0 : i32
    %c0_i32_0 = arith.constant 0 : i32
    %c0_i32_1 = arith.constant 0 : i32
    return %c0_i32, %c0_i32_0 : i32, i32
  }
  func.func @transform_6(%arg0: i32, %arg1: i32) -> (i32, i32) {
    %c0_i32 = arith.constant 0 : i32
    %c0_i32_0 = arith.constant 0 : i32
    %c0_i32_1 = arith.constant 0 : i32
    return %c0_i32, %c0_i32_0 : i32, i32
  }
  func.func @transform_7(%arg0: i32, %arg1: i32) -> (i32, i32) {
    %c0_i32 = arith.constant 0 : i32
    %c0_i32_0 = arith.constant 0 : i32
    %c0_i32_1 = arith.constant 0 : i32
    return %c0_i32, %c0_i32_0 : i32, i32
  }
  func.func @transform_8(%arg0: i32, %arg1: i32) -> (i32, i32) {
    %c0_i32 = arith.constant 0 : i32
    %c0_i32_0 = arith.constant 0 : i32
    %c0_i32_1 = arith.constant 0 : i32
    return %c0_i32, %c0_i32_0 : i32, i32
  }
  func.func @transform_9(%arg0: i32, %arg1: i32) -> (i32, i32, i32) {
    %c0_i32 = arith.constant 0 : i32
    %c0_i32_0 = arith.constant 0 : i32
    return %arg0, %c0_i32, %arg1 : i32, i32, i32
  }
  func.func @transform_10(%arg0: i32, %arg1: i32) -> (i32, i32, i32) {
    %c0_i32 = arith.constant 0 : i32
    %c0_i32_0 = arith.constant 0 : i32
    %c0_i32_1 = arith.constant 0 : i32
    return %arg0, %c0_i32, %c0_i32_0 : i32, i32, i32
  }
  func.func @transform_11(%arg0: i32, %arg1: i32) -> (i32, i32, i32) {
    %c0_i32 = arith.constant 0 : i32
    %c0_i32_0 = arith.constant 0 : i32
    return %arg0, %c0_i32, %arg1 : i32, i32, i32
  }
}

module attributes {stable_mosaic.version = 11 : i64} {
  func.func @_volume_kernel(%arg0: i32, %arg1: i32, %arg2: i32, %arg3: memref<1x16x256xbf16, #tpu.memory_space<vmem>>, %arg4: memref<1x16x256xbf16, #tpu.memory_space<vmem>>, %arg5: memref<1x256x256xbf16, #tpu.memory_space<vmem>>, %arg6: memref<1x1x8x128xf32, #tpu.memory_space<vmem>>) attributes {dimension_semantics = [#tpu.dimension_semantics<parallel>, #tpu.dimension_semantics<parallel>, #tpu.dimension_semantics<arbitrary>], iteration_bounds = array<i64: 2, 1, 1>, scalar_prefetch = 0 : i64, scratch_operands = 0 : i64, tpu.core_type = #tpu.core_type<tc>, window_params = [{transform_indices = @transform_0, window_bounds = array<i64: 1, 16, 256>}, {transform_indices = @transform_1, window_bounds = array<i64: 1, 16, 256>}, {transform_indices = @transform_2, window_bounds = array<i64: 1, 256, 256>}, {transform_indices = @transform_3, window_bounds = array<i64: 1, 1, 8, 128>}]} {
    %c0 = arith.constant 0 : index
    %c0_0 = arith.constant 0 : index
    %c0_1 = arith.constant 0 : index
    %0 = vector.load %arg3[%c0, %c0_0, %c0_1] : memref<1x16x256xbf16, #tpu.memory_space<vmem>>, vector<1x16x256xbf16>
    %1 = vector.shape_cast %0 : vector<1x16x256xbf16> to vector<16x256xbf16>
    %c0_2 = arith.constant 0 : index
    %c0_3 = arith.constant 0 : index
    %c0_4 = arith.constant 0 : index
    %2 = vector.load %arg4[%c0_2, %c0_3, %c0_4] : memref<1x16x256xbf16, #tpu.memory_space<vmem>>, vector<1x16x256xbf16>
    %3 = vector.shape_cast %2 : vector<1x16x256xbf16> to vector<16x256xbf16>
    %cst = arith.constant dense<0.000000e+00> : vector<256x256xf32>
    %4 = tpu.matmul %1, %3, %cst {dimension_numbers = #tpu.dot_dimension_numbers<[0], [0], [1], [1], [0, 1, 1, 1], [], []>} : vector<16x256xbf16>, vector<16x256xbf16>, vector<256x256xf32> -> vector<256x256xf32>
    %cst_5 = arith.constant -2.500000e-01 : f32
    %5 = vector.broadcast %cst_5 : f32 to vector<256x256xf32>
    %6 = arith.mulf %4, %5 : vector<256x256xf32>
    %7 = arith.negf %6 : vector<256x256xf32>
    %8 = math.exp %7 : vector<256x256xf32>
    %cst_6 = arith.constant 1.000000e+00 : f32
    %9 = vector.broadcast %cst_6 : f32 to vector<256x256xf32>
    %10 = arith.addf %9, %8 : vector<256x256xf32>
    %11 = arith.divf %9, %10 : vector<256x256xf32>
    %12 = arith.truncf %11 : vector<256x256xf32> to vector<256x256xbf16>
    %c0_7 = arith.constant 0 : index
    %c0_8 = arith.constant 0 : index
    %c0_9 = arith.constant 0 : index
    %13 = vector.load %arg5[%c0_7, %c0_8, %c0_9] : memref<1x256x256xbf16, #tpu.memory_space<vmem>>, vector<1x256x256xbf16>
    %14 = vector.shape_cast %13 : vector<1x256x256xbf16> to vector<256x256xbf16>
    %15 = vector.shape_cast %12 : vector<256x256xbf16> to vector<1x256x256xbf16>
    tpu.vector_store %arg5[%c0_7, %c0_8, %c0_9], %15 {strides = array<i32>} : memref<1x256x256xbf16, #tpu.memory_space<vmem>>, vector<1x256x256xbf16>,
    %16 = vector.shape_cast %11 : vector<256x256xf32> to vector<1x256x256xf32>
    %cst_10 = arith.constant dense<0xFF800000> : vector<1xf32>
    %17 = vector.multi_reduction <maximumf>, %16, %cst_10 [1, 2] : vector<1x256x256xf32> to vector<1xf32>
    %18 = vector.shape_cast %17 : vector<1xf32> to vector<1x1x1xf32>
    %19 = vector.extract %18[0, 0, 0] : f32 from vector<1x1x1xf32>
    %c0_i32 = arith.constant 0 : i32
    %20 = arith.cmpi eq, %arg2, %c0_i32 : i32
    %21 = arith.extui %20 : i1 to i32
    %c0_i32_11 = arith.constant 0 : i32
    %22 = arith.cmpi ne, %21, %c0_i32_11 : i32
    scf.if %22 {
      %cst_20 = arith.constant 0xFF800000 : f32
      %27 = vector.broadcast %cst_20 : f32 to vector<1x1x8x128xf32>
      %c0_21 = arith.constant 0 : index
      %c0_22 = arith.constant 0 : index
      %c0_23 = arith.constant 0 : index
      %c0_24 = arith.constant 0 : index
      %28 = vector.load %arg6[%c0_21, %c0_22, %c0_23, %c0_24] : memref<1x1x8x128xf32, #tpu.memory_space<vmem>>, vector<1x1x8x128xf32>
      tpu.vector_store %arg6[%c0_21, %c0_22, %c0_23, %c0_24], %27 {strides = array<i32>} : memref<1x1x8x128xf32, #tpu.memory_space<vmem>>, vector<1x1x8x128xf32>,
    } else {
    }
    %c0_12 = arith.constant 0 : index
    %c0_13 = arith.constant 0 : index
    %c0_14 = arith.constant 0 : index
    %c0_15 = arith.constant 0 : index
    %23 = vector.load %arg6[%c0_12, %c0_13, %c0_14, %c0_15] : memref<1x1x8x128xf32, #tpu.memory_space<vmem>>, vector<1x1x8x128xf32>
    %24 = vector.broadcast %19 : f32 to vector<1x1x8x128xf32>
    %25 = arith.maximumf %23, %24 : vector<1x1x8x128xf32>
    %c0_16 = arith.constant 0 : index
    %c0_17 = arith.constant 0 : index
    %c0_18 = arith.constant 0 : index
    %c0_19 = arith.constant 0 : index
    %26 = vector.load %arg6[%c0_16, %c0_17, %c0_18, %c0_19] : memref<1x1x8x128xf32, #tpu.memory_space<vmem>>, vector<1x1x8x128xf32>
    tpu.vector_store %arg6[%c0_16, %c0_17, %c0_18, %c0_19], %25 {strides = array<i32>} : memref<1x1x8x128xf32, #tpu.memory_space<vmem>>, vector<1x1x8x128xf32>,
    return
  }
  func.func @transform_0(%arg0: i32, %arg1: i32, %arg2: i32) -> (i32, i32, i32) {
    %c0_i32 = arith.constant 0 : i32
    %c0_i32_0 = arith.constant 0 : i32
    return %arg0, %c0_i32, %arg1 : i32, i32, i32
  }
  func.func @transform_1(%arg0: i32, %arg1: i32, %arg2: i32) -> (i32, i32, i32) {
    %c0_i32 = arith.constant 0 : i32
    %c0_i32_0 = arith.constant 0 : i32
    return %arg0, %c0_i32, %arg2 : i32, i32, i32
  }
  func.func @transform_2(%arg0: i32, %arg1: i32, %arg2: i32) -> (i32, i32, i32) {
    %c0_i32 = arith.constant 0 : i32
    return %arg0, %arg1, %arg2 : i32, i32, i32
  }
  func.func @transform_3(%arg0: i32, %arg1: i32, %arg2: i32) -> (i32, i32, i32, i32) {
    %c0_i32 = arith.constant 0 : i32
    %c0_i32_0 = arith.constant 0 : i32
    %c0_i32_1 = arith.constant 0 : i32
    return %arg0, %arg1, %c0_i32, %c0_i32_0 : i32, i32, i32, i32
  }
}

</mosaic_0001>

<bundles_post_ra>
// kernel: main_model_forward.2
= control target key start
LH: loop header
LB: loop body
LE: loop exit
PB: predicated region body
PF: predicated region fallthrough
CT: control target
= control target key end

     0   :  { %s1643_s0 = inlined_call_operand.vmem [shape: f32[2,8,256], index: 0, kind: input, shape index: {}]   ;;  %s1644_s1 = inlined_call_operand.vmem [shape: f32[32,8], index: 1, kind: input, shape index: {}]   ;;  %s1645_s2 = inlined_call_operand.vmem [shape: f32[32,1], index: 2, kind: input, shape index: {}]   ;;  %s1646_s3 = inlined_call_operand.vmem [shape: f32[32,1], index: 3, kind: input, shape index: {}]   ;;  %s1647_s4 = inlined_call_operand.<no memory space> [shape: f32[1,1], index: 4, kind: input, shape index: {}]   ;;  %s1648_s5 = inlined_call_operand.hbm [shape: f32[32,32], index: 5, kind: input, shape index: {}]   ;;  %s1649_s6 = inlined_call_operand.vmem [shape: f32[32,1], index: 6, kind: input, shape index: {}]   ;;  %s1650_s7 = inlined_call_operand.hbm [shape: f32[16,32], index: 7, kind: input, shape index: {}]   ;;  %s1651_s8 = inlined_call_operand.vmem [shape: f32[16,1], index: 8, kind: input, shape index: {}]   ;;  %s1652_s9 = inlined_call_operand.vmem [shape: f32[2,1,256], index: 9, kind: output, shape index: {0}]   ;;  %s1653_s10 = inlined_call_operand.vmem [shape: f32[2,1,128], index: 10, kind: output, shape index: {1}]   ;;  %s1654_s11 = inlined_call_operand.vmem [shape: bf16[2,16,256], index: 11, kind: output, shape index: {2}]  }
   0x1   :  { %v17_v0 = vstv %s1647_s4 }
   0x2   :  { %18 = vst [vmem:[#allocation2] sm:$0x1] %v17_v0 }
   0x3   :  { %19 = vsyncpa [#allocation4], 0 }
   0x4   :  { %20 = vsyncpa [#allocation6], 0  ;;  %s1449_s19 = smov 0   ;;  %s1451_s20 = smov 0  }
   0x5   :  { %s1453_s21 = smov 0  }
   0x6 LB: > { %s1197_s4 = sadd.s32 4294967295, %s1376_s21   ;;  %s38_s22 = sadd.s32 1, %s1372_s20  ;;  %s1376_s21 = sphi %s1453_s21, %s26_s21   ;;  %s1372_s20 = sphi %s1451_s20, %s1659_s20   ;;  %s1368_s19 = sphi %s1449_s19, %s1658_s19  }
   0x7   : > { %p40_p0 = scmp.ge.s32.totalorder %s38_s22, 2  ;;  %p1199_p1 = scmp.ge.s32.totalorder %s1376_s21, 1 }
   0x8   : > { %p321_p2 = scmp.lt.s32.totalorder %s1376_s21, 3  ;;  %p1474_p4 = scmp.eq.s32.totalorder %s1197_s4, 0 }
   0x9   : > { %s1661_s22 = smov (%p40_p0, %s38_s22), 0  ;;  %s1378_s25 = smov [#allocation3]  }
   0xa   : > { %p1470_p3 = pnand %p1199_p1, %p321_p2  ;;  %s345_s26 = sshll.u32 %s1378_s25, 4  ;;  %s346_s26 = int_to_ptr.vmem [resolvable:$true] %s345_s26 }
   0xb   : > { %s1379_s28 = smov [#allocation5]   ;;  %s1305_s30 = scalar_lea.vmem %s346_s26, 512 }
   0xc   : > { %p1241_p5 = pneg %p1470_p3  ;;  %s361_s29 = sshll.u32 %s1379_s28, 4  ;;  %s362_s29 = int_to_ptr.vmem [resolvable:$true] %s361_s29 }
   0xd   : > { %p1306_p8 = scmp.ne.s32.totalorder %s346_s26, %s1305_s30  ;;  %p1313_p11 = scmp.lt.s32.totalorder %s346_s26, %s346_s26 }
   0xe   : > { %p1482_p6 = pnand %p1474_p4, %p1241_p5  ;;  %p1314_p12 = scmp.lt.s32.totalorder %s1305_s30, %s1305_s30 }
  0x10   : > { %p1296_p7 = pneg %p1482_p6  ;;  %p1315_p13 = por %p1314_p12, %p1313_p11 }
  0x12   : > { %p1308_p9 = pnand %p1306_p8, %p1296_p7 }
  0x14   : > { %p1309_p10 = pneg %p1308_p9 }
  0x16   : > { %p1316_p0 = pnand %p1315_p13, %p1309_p10 }
  0x18   : > { %1319 = shalt.err (!%p1316_p0)
}
  0x19   : > { %s1380_s12 = smov 128   ;;  %s1381_s13 = smov 8  }
  0x1a   : > { %1244 = dma.hbm_to_vmem [thread:$0]  (!%p1482_p6), %s1648_s5, 512, %s346_s26, [#allocation4], %s1380_s12, %s1380_s12, %s1381_s13  }
  0x1b   : > { %s1331_s16 = scalar_lea.vmem %s362_s29, 256  ;;  %p1339_p8 = scmp.lt.s32.totalorder %s362_s29, %s362_s29 }
  0x1c   : > { %p1332_p1 = scmp.ne.s32.totalorder %s362_s29, %s1331_s16  ;;  %p1340_p9 = scmp.lt.s32.totalorder %s1331_s16, %s1331_s16 }
  0x1e   : > { %p1334_p2 = pnand %p1332_p1, %p1296_p7  ;;  %p1341_p11 = por %p1340_p9, %p1339_p8 }
  0x20   : > { %p1335_p5 = pneg %p1334_p2 }
  0x22   : > { %p1342_p10 = pnand %p1341_p11, %p1335_p5 }
  0x24   : > { %1345 = shalt.err (!%p1342_p10)
}
  0x25   : > { %1247 = dma.hbm_to_vmem [thread:$0]  (!%p1482_p6), %s1650_s7, 256, %s362_s29, [#allocation6], %s1380_s12, %s1380_s12, %s1381_s13  }
  0x26   : > { %393 = sbr.rel (%p1470_p3) target bundleno = 698 (0x2ba), region = 56 }
  0x2b   : > { %1359 = dma.done.wait (%p1474_p4), [#allocation4], 512  }
  0x2c   : > { %1361 = vsyncadd (%p1474_p4), [#allocation4], 4294966784 }
  0x2d   : > { %1363 = dma.done.wait (%p1474_p4), [#allocation6], 256  }
  0x2e   : > { %1365 = vsyncadd (%p1474_p4), [#allocation6], 4294967040  ;;  %p457_p7 = scmp.lt.s32.totalorder %s1368_s19, 1  ;;  %v1382_v1 = vmov 0.0   ;;  %v1383_v2 = vmov 0   ;;  %v490_v5 = vld [vmem:[%s1644_s1] sm:$0xff] }
  0x2f   : > { %595 = vmatprep.mubr.f32.mxu0 %v1382_v1  ;;  %1284 = vset.pattern.permute.xlu0 %v1383_v2  ;;  %vm518_vm0 = vcmask 64512   ;;  %v497_v6 = vld [vmem:[%s1645_s2 + $0x18] sm:$0xff]  ;;  %v495_v7 = vld [vmem:[%s1645_s2 + $0x8] sm:$0xff]  ;;  %v496_v9 = vld [vmem:[%s1645_s2 + $0x10] sm:$0xff]  ;;  %vm782_vm9 = vcmask 261120  }
  0x30   : > { %s1663_s19 = smov (!%p457_p7, %s1368_s19), 1  ;;  %1285 = vset.pattern.permute.xlu1 %v1383_v2  ;;  %859 = vmatprep.mubr.f32.mxu1 %v1382_v1  ;;  %v491_v8 = vld [vmem:[%s1644_s1 + $0x8] sm:$0xff]  ;;  %v494_v10 = vld [vmem:[%s1645_s2] sm:$0xff]  ;;  %v492_v11 = vld [vmem:[%s1644_s1 + $0x10] sm:$0xff] }
  0x31   : > { %s1227_s4 = sshll.u32 %s1663_s19, 4  ;;  %515 = vperm.xlu0 %1284, %v497_v6   ;;  %505 = vperm.xlu1 %1285, %v495_v7   ;;  %v761_v12 = vld [vmem:[%s1649_s6 + $0x18] sm:$0xff]  ;;  %v760_v13 = vld [vmem:[%s1649_s6 + $0x10] sm:$0xff]  ;;  %v759_v15 = vld [vmem:[%s1649_s6 + $0x8] sm:$0xff]  ;;  %s1208_s13 = sshll.u32 %s1663_s19, 1 }
  0x32   : > { %s464_s25 = scalar_lea.vmem %s1643_s0, %s1227_s4  ;;  %v493_v14 = vld [vmem:[%s1644_s1 + $0x18] sm:$0xff]  ;;  %v758_v16 = vld [vmem:[%s1649_s6] sm:$0xff]  ;;  %v645_v18 = vld [vmem:[%s1646_s3 + $0x8] sm:$0xff]  ;;  %s473_s16 = scalar_lea.vmem %s1652_s9, %s1208_s13 }
  0x33   : > { %v489_v3 = vld [vmem:[%s464_s25 + $0x8] sm:$0xff]  ;;  %v488_v4 = vld [vmem:[%s464_s25] sm:$0xff]  ;;  %v646_v19 = vld [vmem:[%s1646_s3 + $0x10] sm:$0xff]  ;;  %s1613_s23 = scalar_lea.vmem %s1653_s10, %s1663_s19  ;;  %s486_s27 = scalar_lea.vmem %s1654_s11, %s1227_s4 }
  0x34   : > { %561 = vmatprep.subr.mxu0 %v489_v3  ;;  %v644_v17 = vld [vmem:[%s1646_s3] sm:$0xff]  ;;  %v647_v20 = vld [vmem:[%s1646_s3 + $0x18] sm:$0xff]  ;;  %v911_v23 = vld [vmem:[%s1651_s8 + $0x8] sm:$0xff] }
  0x35   : > { %562 = vmatpush1.msra.mxu0 %v488_v4  ;;  %510 = vperm.xlu0 %1284, %v496_v9   ;;  %v694_v21 = vld [vmem:[#allocation2] sm:$0x1] }
  0x36   : > { %1211 = vmatmul.mubr.msk.f32.vlgmr.msra.gmra.mxu0 %vm518_vm0, %v490_v5  ;;  %500 = vperm.xlu1 %1285, %v494_v10   ;;  %v910_v22 = vld [vmem:[%s1651_s8] sm:$0xff] }
  0x37   : > { %601 = vmatprep.mubr.f32.mxu0 %v1382_v1 }
  0x39   : > { %779 = vperm.xlu0 %1284, %v761_v12  }
  0x3a   : > { %1212 = vmatmul.mubr.msk.f32.gmra.mxu0 %vm518_vm0, %v491_v8  ;;  %774 = vperm.xlu1 %1285, %v760_v13  }
  0x3b   : > { %607 = vmatprep.mubr.f32.mxu0 %v1382_v1 }
  0x3d   : > { %769 = vperm.xlu0 %1284, %v759_v15   ;;  %v700_v15 = vlaneseq }
  0x3e   : > { %1213 = vmatmul.mubr.msk.f32.gmra.mxu0 %vm518_vm0, %v492_v11  ;;  %764 = vperm.xlu1 %1285, %v758_v16  }
  0x3f   : > { %613 = vmatprep.mubr.f32.mxu0 %v1382_v1  ;;  %vm738_vm10 = vcmp.lt.s32.totalorder %v700_v15, 256 }
  0x41   : > { %650 = vperm.xlu0 %1284, %v644_v17  }
  0x42   : > { %1214 = vmatmul.mubr.msk.f32.gmra.mxu0 %vm518_vm0, %v493_v14  ;;  %655 = vperm.xlu1 %1285, %v645_v18  }
  0x43   : > { %992 = vmatprep.mubr.f32.mxu0 %v1382_v1 }
  0x45   : > { %660 = vperm.xlu0 %1284, %v646_v19  }
  0x46   : > { %665 = vperm.xlu1 %1285, %v647_v20  }
  0x49   : > { %697 = vperm.xlu0 %1284, %v694_v21   ;;  %v701_v21 = vshrl.u32 %v700_v15, 7 }
  0x4d   : > { %914 = vperm.xlu0 %1284, %v910_v22  }
  0x51   : > { %919 = vperm.xlu0 %1284, %v911_v23  }
  0xac   : > { %v516_v24 = vpop.permute.xlu0 %515  ;;  %v506_v25 = vpop.permute.xlu1 %505 }
  0xb0   : > { %v511_v26 = vpop.permute.xlu0 %510 }
  0xb1   : > { %v501_v27 = vpop.permute.xlu1 %500 }
  0xb4   : > { %v1588_v28 = vpop.permute.xlu0 %779 }
  0xb5   : > { %v1590_v29 = vpop.permute.xlu1 %774 }
  0xb8   : > { %v1592_v31 = vpop.permute.xlu0 %769 }
  0xb9   : > { %v1594_v34 = vpop.permute.xlu1 %764 }
  0xbc   : > { %v651_v40 = vpop.permute.xlu0 %650 }
  0xbd   : > { %v656_v47 = vpop.permute.xlu1 %655 }
  0xc0   : > { %v661_v57 = vpop.permute.xlu0 %660 }
  0xc1   : > { %v666_v3 = vpop.permute.xlu1 %665 }
  0xf6   : > { %v597_v30 = vpop.f32.mrf.mxu0 }
  0xf7   : > { %v598_v32 = vadd.f32 %v597_v30, %v501_v27 }
  0xf8   : > { %v599_v33 = vpop.f32.mrf.mxu0 }
  0xf9   : > { %v600_v35 = vadd.f32 %v599_v33, %v501_v27  ;;  %v628_v38 = vmul.f32 0.01, %v598_v32  ;;  %vm620_vm2 = vcmp.gt.f32.partialorder %v598_v32, 0.0  ;;  %v702_v27 = vsub.s32 0, %v701_v21  ;;  %v755_v33 = vld [vmem:[#allocation3 + $0x8] sm:$0xff] }
  0xfa   : > { %v603_v36 = vpop.f32.mrf.mxu0 }
  0xfb   : > { %v604_v37 = vadd.f32 %v603_v36, %v506_v25  ;;  %v629_v43 = vmul.f32 0.01, %v600_v35  ;;  %vm621_vm3 = vcmp.gt.f32.partialorder %v600_v35, 0.0  ;;  %v636_v50 = vsel %vm620_vm2, %v598_v32, %v628_v38 }
  0xfc   : > { %v605_v39 = vpop.f32.mrf.mxu0  ;;  %v668_v0 = vmul.f32 %v651_v40, %v636_v50 }
  0xfd   : > { %v630_v41 = vmul.f32 0.01, %v604_v37  ;;  %v606_v42 = vadd.f32 %v605_v39, %v506_v25  ;;  %vm622_vm1 = vcmp.gt.f32.partialorder %v604_v37, 0.0  ;;  %v637_v56 = vsel %vm621_vm3, %v600_v35, %v629_v43 }
  0xfe   : > { %v609_v44 = vpop.f32.mrf.mxu0  ;;  %v669_v7 = vmul.f32 %v651_v40, %v637_v56 }
  0xff   : > { %v631_v45 = vmul.f32 0.01, %v606_v42  ;;  %v610_v46 = vadd.f32 %v609_v44, %v511_v26  ;;  %vm623_vm4 = vcmp.gt.f32.partialorder %v606_v42, 0.0  ;;  %v638_v48 = vsel %vm622_vm1, %v604_v37, %v630_v41  ;;  %v698_v37 = vpop.permute.xlu0 %697  ;;  %v756_v41 = vld [vmem:[#allocation3 + $0x10] sm:$0xff] }
 0x100   : > { %v611_v49 = vpop.f32.mrf.mxu0  ;;  %v670_v54 = vmul.f32 %v656_v47, %v638_v48  ;;  %v703_v38 = vrot.slane %v698_v37, %v702_v27 }
 0x101   : > { %v632_v51 = vmul.f32 0.01, %v610_v46  ;;  %v639_v52 = vsel %vm623_vm4, %v606_v42, %v631_v45  ;;  %v612_v53 = vadd.f32 %v611_v49, %v511_v26  ;;  %vm624_vm5 = vcmp.gt.f32.partialorder %v610_v46, 0.0 }
 0x102   : > { %v615_v55 = vpop.f32.mrf.mxu0  ;;  %v671_v61 = vmul.f32 %v656_v47, %v639_v52  ;;  %v676_v8 = vadd.f32 %v670_v54, %v668_v0 }
 0x103   : > { %v633_v58 = vmul.f32 0.01, %v612_v53  ;;  %v616_v59 = vadd.f32 %v615_v55, %v516_v24  ;;  %vm625_vm6 = vcmp.gt.f32.partialorder %v612_v53, 0.0  ;;  %v640_v60 = vsel %vm624_vm5, %v610_v46, %v632_v51  ;;  %v757_v46 = vld [vmem:[#allocation3 + $0x18] sm:$0xff] }
 0x104   : > { %v617_v62 = vpop.f32.mrf.mxu0  ;;  %v672_v63 = vmul.f32 %v661_v57, %v640_v60  ;;  %v685_v12 = vadd.f32 %v671_v61, %v669_v7 }
 0x105   : > { %v618_v2 = vadd.f32 %v617_v62, %v516_v24  ;;  %vm626_vm7 = vcmp.gt.f32.partialorder %v616_v59, 0.0  ;;  %v634_v4 = vmul.f32 0.01, %v616_v59  ;;  %v641_v5 = vsel %vm625_vm6, %v612_v53, %v633_v58  ;;  %v754_v24 = vld [vmem:[#allocation3] sm:$0xff] }
 0x106   : > { %v673_v6 = vmul.f32 %v661_v57, %v641_v5  ;;  %v677_v13 = vadd.f32 %v676_v8, %v672_v63  ;;  %v1385_v62 = vmov -inf  }
 0x107   : > { %vm627_vm8 = vcmp.gt.f32.partialorder %v618_v2, 0.0  ;;  %v635_v9 = vmul.f32 0.01, %v618_v2  ;;  %v642_v10 = vsel %vm626_vm7, %v616_v59, %v634_v4  ;;  %749 = vst [vmem:[%s1613_s23] sm:$0x1] %v1385_v62 }
 0x108   : > { %v674_v11 = vmul.f32 %v666_v3, %v642_v10  ;;  %v686_v17 = vadd.f32 %v685_v12, %v673_v6 }
 0x109   : > { %v643_v14 = vsel %vm627_vm8, %v618_v2, %v635_v9 }
 0x10a   : > { %v675_v16 = vmul.f32 %v666_v3, %v643_v14  ;;  %819 = vmatprep.subr.mxu1 %v643_v14  ;;  %v678_v18 = vadd.f32 %v677_v13, %v674_v11 }
 0x10b   : > { %820 = vmatpush1.msra.mxu1 %v642_v10 }
 0x10c   : > { %821 = vmatprep.subr.mxu1 %v641_v5  ;;  %v687_v19 = vadd.f32 %v686_v17, %v675_v16  ;;  %v679_v20 = vrot.slane %v678_v18, 4 }
 0x10d   : > { %822 = vmatpush1.msra.mxu1 %v640_v60 }
 0x10e   : > { %823 = vmatprep.subr.mxu1 %v639_v52  ;;  %v688_v22 = vrot.slane %v687_v19, 4  ;;  %v680_v23 = vadd.f32 %v679_v20, %v678_v18  ;;  %v1384_v52 = vmov 1966171168  }
 0x10f   : > { %824 = vmatpush1.msra.mxu1 %v638_v48  ;;  %v722_v53 = vunpack.c.l.s4 %v1384_v52 }
 0x110   : > { %v689_v25 = vadd.f32 %v688_v22, %v687_v19  ;;  %825 = vmatprep.subr.mxu1 %v637_v56  ;;  %v681_v26 = vrot.slane %v680_v23, 2 }
 0x111   : > { %826 = vmatpush1.msra.mxu1 %v636_v50  ;;  %v723_v54 = vunpack.c.0.s8 %v722_v53 }
 0x112   : > { %v690_v30 = vrot.slane %v689_v25, 2  ;;  %v682_v32 = vadd.f32 %v681_v26, %v680_v23  ;;  %1217 = vmatmul.mubr.msk.f32.vlgmr.msra.gmra.mxu1 %vm782_vm9, %v754_v24 }
 0x113   : > { %865 = vmatprep.mubr.f32.mxu1 %v1382_v1  ;;  %v726_v56 = vsub.s32 %v723_v54, %v701_v21 }
 0x114   : > { %v691_v35 = vadd.f32 %v690_v30, %v689_v25  ;;  %v683_v36 = vrot.slane %v682_v32, 1  ;;  %v908_v30 = vld [vmem:[#allocation5] sm:$0xff] }
 0x116   : > { %v692_v39 = vrot.slane %v691_v35, 1  ;;  %v684_v40 = vadd.f32 %v683_v36, %v682_v32  ;;  %1218 = vmatmul.mubr.msk.f32.gmra.mxu1 %vm782_vm9, %v755_v33  ;;  %v909_v33 = vld [vmem:[#allocation5 + $0x8] sm:$0xff] }
 0x117   : > { %871 = vmatprep.mubr.f32.mxu1 %v1382_v1 }
 0x118   : > { %v693_v42 = vadd.f32 %v692_v39, %v691_v35  ;;  %v704_v43 = vadd.f32 %v703_v38, %v684_v40  ;;  %v750_v35 = vld [vmem:[%s1613_s23] sm:$0x1] }
 0x11a   : > { %v705_v44 = vadd.f32 %v703_v38, %v693_v42  ;;  %v1215_v45 = vmul.f32 -1.442695, %v704_v43  ;;  %1219 = vmatmul.mubr.msk.f32.gmra.mxu1 %vm782_vm9, %v756_v41  ;;  %v915_v38 = vpop.permute.xlu0 %914 }
 0x11b   : > { %877 = vmatprep.mubr.f32.mxu1 %v1382_v1 }
 0x11c   : > { %v1216_v47 = vmul.f32 -1.442695, %v705_v44  ;;  %1286 = vpow2.f32 %v1215_v45 }
 0x11e   : > { %1288 = vpow2.f32 %v1216_v47  ;;  %1220 = vmatmul.mubr.msk.f32.gmra.mxu1 %vm782_vm9, %v757_v46  ;;  %v920_v44 = vpop.permute.xlu0 %919 }
 0x129   : > { %v1287_v48 = vpop.eup %1286 }
 0x12a   : > { %v712_v49 = vadd.f32 1.0, %v1287_v48 }
 0x12b   : > { %v1289_v50 = vpop.eup %1288 }
 0x12c   : > { %v713_v51 = vadd.f32 1.0, %v1289_v50  ;;  %1290 = vrcp.f32 %v712_v49 }
 0x12e   : > { %1292 = vrcp.f32 %v713_v51 }
 0x139   : > { %v1291_v55 = vpop.eup %1290 }
 0x13b   : > { %v1293_v57 = vpop.eup %1292 }
 0x13c   : > { %v741_v58 = vmax.f32 %v1291_v55, %v1293_v57  ;;  %v720_v59 = vcombine.low %v1291_v55, %v1293_v57 }
 0x13e   : > { %742 = vmax.xlane.f32.xlu1 %v741_v58  ;;  %v727_v60 = vrot.slane %v720_v59, %v726_v56 }
 0x140   : > { %v734_v61 = vrot.slane %v727_v60, %v726_v56 }
 0x142   : > { %740 = vst.msk [vmem:[%s473_s16] sm:$0x3] %vm738_vm10, %v734_v61 }
 0x1c7   : > { %v743_v63 = vpop.xlane.xlu1 %742 }
 0x1c8   : > { %1231 = vpush %v743_v63 }
 0x1d2   : > { %v861_v0 = vpop.f32.mrf.mxu1 }
 0x1d3   : > { %v862_v19 = vadd.f32 %v861_v0, %v1594_v34 }
 0x1d4   : > { %v863_v2 = vpop.f32.mrf.mxu1 }
 0x1d5   : > { %v864_v14 = vadd.f32 %v863_v2, %v1594_v34  ;;  %v892_v24 = vmul.f32 0.01, %v862_v19  ;;  %vm884_vm2 = vcmp.gt.f32.partialorder %v862_v19, 0.0 }
 0x1d6   : > { %v867_v3 = vpop.f32.mrf.mxu1 }
 0x1d7   : > { %v868_v15 = vadd.f32 %v867_v3, %v1592_v31  ;;  %vm885_vm1 = vcmp.gt.f32.partialorder %v864_v14, 0.0  ;;  %v900_v32 = vsel %vm884_vm2, %v862_v19, %v892_v24 }
 0x1d8   : > { %v869_v4 = vpop.f32.mrf.mxu1 }
 0x1d9   : > { %v870_v12 = vadd.f32 %v869_v4, %v1592_v31  ;;  %v894_v22 = vmul.f32 0.01, %v868_v15  ;;  %vm886_vm0 = vcmp.gt.f32.partialorder %v868_v15, 0.0 }
 0x1da   : > { %v873_v5 = vpop.f32.mrf.mxu1 }
 0x1db   : > { %v874_v10 = vadd.f32 %v873_v5, %v1590_v29  ;;  %v895_v21 = vmul.f32 0.01, %v870_v12  ;;  %vm887_vm15 = vcmp.gt.f32.partialorder %v870_v12, 0.0  ;;  %v902_v26 = vsel %vm886_vm0, %v868_v15, %v894_v22 }
 0x1dc   : > { %v875_v6 = vpop.f32.mrf.mxu1 }
 0x1dd   : > { %v876_v8 = vadd.f32 %v875_v6, %v1590_v29  ;;  %v896_v20 = vmul.f32 0.01, %v874_v10  ;;  %vm888_vm14 = vcmp.gt.f32.partialorder %v874_v10, 0.0  ;;  %v903_v34 = vsel %vm887_vm15, %v870_v12, %v895_v21 }
 0x1de   : > { %v879_v7 = vpop.f32.mrf.mxu1 }
 0x1df   : > { %v880_v9 = vadd.f32 %v879_v7, %v1588_v28  ;;  %v897_v17 = vmul.f32 0.01, %v876_v8  ;;  %vm889_vm13 = vcmp.gt.f32.partialorder %v876_v8, 0.0  ;;  %v904_v25 = vsel %vm888_vm14, %v874_v10, %v896_v20 }
 0x1e0   : > { %v881_v11 = vpop.f32.mrf.mxu1 }
 0x1e1   : > { %v882_v13 = vadd.f32 %v881_v11, %v1588_v28  ;;  %v898_v16 = vmul.f32 0.01, %v880_v9  ;;  %vm890_vm11 = vcmp.gt.f32.partialorder %v880_v9, 0.0  ;;  %v893_v28 = vmul.f32 0.01, %v864_v14 }
 0x1e2   : > { %v905_v31 = vsel %vm889_vm13, %v876_v8, %v897_v17 }
 0x1e3   : > { %v899_v18 = vmul.f32 0.01, %v882_v13  ;;  %vm891_vm12 = vcmp.gt.f32.partialorder %v882_v13, 0.0  ;;  %v906_v23 = vsel %vm890_vm11, %v880_v9, %v898_v16  ;;  %v901_v27 = vsel %vm885_vm1, %v864_v14, %v893_v28 }
 0x1e5   : > { %v907_v29 = vsel %vm891_vm12, %v882_v13, %v899_v18 }
 0x1e6   : > { %952 = vmatprep.subr.mxu0 %v907_v29 }
 0x1e7   : > { %953 = vmatpush1.msra.mxu0 %v906_v23 }
 0x1e8   : > { %954 = vmatprep.subr.mxu0 %v905_v31 }
 0x1e9   : > { %955 = vmatpush1.msra.mxu0 %v904_v25 }
 0x1ea   : > { %956 = vmatprep.subr.mxu0 %v903_v34 }
 0x1eb   : > { %957 = vmatpush1.msra.mxu0 %v902_v26 }
 0x1ec   : > { %958 = vmatprep.subr.mxu0 %v901_v27 }
 0x1ed   : > { %959 = vmatpush1.msra.mxu0 %v900_v32 }
 0x1ee   : > { %1221 = vmatmul.mubr.msk.f32.vlgmr.msra.gmra.mxu0 %vm782_vm9, %v908_v30 }
 0x1ef   : > { %998 = vmatprep.mubr.f32.mxu0 %v1382_v1 }
 0x1f2   : > { %1222 = vmatmul.mubr.msk.f32.gmra.mxu0 %vm782_vm9, %v909_v33 }
 0x1f9   : > { %s1232_s24 = spop %1231 }
 0x1fa   : > { %v751_v36 = vstv %s1232_s24 }
 0x1fb   : > { %v752_v37 = vmax.f32 %v750_v35, %v751_v36 }
 0x1fd   : > { %753 = vst [vmem:[%s1613_s23] sm:$0x1] %v752_v37 }
 0x2ae   : > { %v994_v39 = vpop.f32.mrf.mxu0 }
 0x2af   : > { %v995_v41 = vadd.f32 %v994_v39, %v915_v38 }
 0x2b0   : > { %v996_v40 = vpop.f32.mrf.mxu0 }
 0x2b1   : > { %v997_v42 = vadd.f32 %v996_v40, %v915_v38 }
 0x2b2   : > { %v1000_v43 = vpop.f32.mrf.mxu0 }
 0x2b3   : > { %v1229_v1 = vpack.c.bf16 %v997_v42, %v995_v41  ;;  %v1001_v46 = vadd.f32 %v1000_v43, %v920_v44 }
 0x2b4   : > { %v1002_v45 = vpop.f32.mrf.mxu0 }
 0x2b5   : > { %1017 = vst [vmem:[%s486_s27] sm:$0xff] %v1229_v1  ;;  %v1003_v47 = vadd.f32 %v1002_v45, %v920_v44 }
 0x2b7   : > { %v1230_v48 = vpack.c.bf16 %v1003_v47, %v1001_v46 }
 0x2b9   : > { %1018 = vst [vmem:[%s486_s27 + $0x8] sm:$0xff] %v1230_v48 }
 0x2ba PF: > { %s26_s21 = sadd.s32 1, %s1376_s21   ;;  %s1658_s19 = smov %s1372_s20 }
 0x2bb   : > { %p23_p3 = scmp.ge.s32.totalorder %s26_s21, 4   ;;  %s1659_s20 = smov %s1661_s22 }
 0x2bd   :  { %25 = sbr.rel (!%p23_p3) target bundleno = 6 (0x6), region = 123 }
 0x2c2   :  { %1084 = vsyncpa [#allocation4], 1 }
 0x2c3   :  { %1086 = vsyncpa [#allocation4 + $0x1], 1 }
 0x2c4   :  { %1087 = vsyncpa [#allocation6], 1 }

// kernel: main_model_forward.3
= control target key start
LH: loop header
LB: loop body
LE: loop exit
PB: predicated region body
PF: predicated region fallthrough
CT: control target
= control target key end

     0   :  { %s2007_s12 = smov 0   ;;  %s2009_s13 = smov 0   ;;  %s2259_s0 = inlined_call_operand.vmem [shape: bf16[2,16,256], index: 0, kind: input, shape index: {}, may-alias: {0,1}]   ;;  %s2260_s1 = inlined_call_operand.vmem [shape: bf16[2,16,256], index: 1, kind: input, shape index: {}, may-alias: {0,1}]   ;;  %s2261_s2 = inlined_call_operand.vmem [shape: bf16[2,256,256], index: 2, kind: output, shape index: {0}]   ;;  %s2262_s3 = inlined_call_operand.vmem [shape: f32[2,1,8,128], index: 3, kind: output, shape index: {1}]  }
   0x1   :  { %s2011_s14 = smov 0  }
   0x2 LB: > { %s33_s15 = sadd.s32 1, %s1980_s13  ;;  %p1509_p0 = scmp.ge.s32.totalorder %s1984_s14, 1  ;;  %s1984_s14 = sphi %s2011_s14, %s14_s14   ;;  %s1980_s13 = sphi %s2009_s13, %s2264_s13   ;;  %s1976_s12 = sphi %s2007_s12, %s2263_s12  }
   0x3   : > { %p35_p1 = scmp.ge.s32.totalorder %s33_s15, 2  ;;  %p189_p2 = scmp.lt.s32.totalorder %s1984_s14, 3 }
   0x5   : > { %s2266_s15 = smov (%p35_p1, %s33_s15), 0  ;;  %p190_p3 = pnand %p1509_p0, %p189_p2 }
   0x6   : > { %p243_p4 = scmp.lt.s32.totalorder (!%p190_p3), %s1976_s12, 1 }
   0x7   : > { %193 = sbr.rel (%p190_p3) target bundleno = 675 (0x2a3), region = 28 }
   0xc   : > { %v1986_v0 = vmov 0   ;;  %s2268_s12 = smov (!%p243_p4, %s1976_s12), 1  ;;  %vm342_vm0 = vcmask 130048  }
   0xd   : > { %423 = vmatprep.mubr.bf16.mxu0 %v1986_v0  ;;  %503 = vmatprep.mubr.bf16.mxu1 %v1986_v0  ;;  %s1635_s16 = sshll.u32 %s2268_s12, 4  ;;  %s1637_s23 = sshll.u32 %s2268_s12, 8 }
   0xe   : > { %s250_s19 = scalar_lea.vmem %s2259_s0, %s1635_s16  ;;  %s260_s22 = scalar_lea.vmem %s2260_s1, %s1635_s16 }
   0xf   : > { %v1700_v1 = vld [vmem:[%s250_s19] ss:$8 sps:$4 sm:$0xff]   ;;  %v1703_v2 = vld [vmem:[%s260_s22 + $0x4] ss:$8 sps:$4 sm:$0xff]   ;;  %s2058_s26 = scalar_lea.vmem %s2261_s2, %s1637_s23  ;;  %s1516_s27 = sshll.u32 %s2268_s12, 3 }
  0x10   : > { %300 = vxpose.xlu0.c.b16.start.end [1/1] (short) %v1700_v1, 128  ;;  %v1705_v3 = vld [vmem:[%s260_s22] ss:$8 sps:$4 sm:$0xff]   ;;  %405 = vmatprep.subr.bf16.mxu0 %v1703_v2  ;;  %v1702_v4 = vld [vmem:[%s250_s19 + $0x4] ss:$8 sps:$4 sm:$0xff]   ;;  %s284_s4 = scalar_lea.vmem %s2262_s3, %s1516_s27 }
  0x11   : > { %1670 = vmatprep.subr.bf16.mxu1 %v1703_v2  ;;  %406 = vmatpush1.bf16.msra.mxu0 %v1705_v3 }
  0x12   : > { %1671 = vmatpush1.bf16.msra.mxu1 %v1705_v3 }
  0x2d   : > { %316 = vxpose.xlu0.c.b16.start.end [1/1] (short) %v1702_v4, 128 }
  0x72   : > { %v308_v5 = vpop.trf.xlu0 }
  0x73   : > { %1521 = vmatmul.mubr.msk.bf16.vlgmr.msra.gmra.mxu0 %vm342_vm0, %v308_v5 }
  0x74   : > { %433 = vmatprep.mubr.bf16.mxu0 %v1986_v0 }
  0x76   : > { %v309_v6 = vpop.trf.xlu0 }
  0x7a   : > { %v310_v7 = vpop.trf.xlu0 }
  0x7b   : > { %1522 = vmatmul.mubr.msk.bf16.gmra.mxu0 %vm342_vm0, %v309_v6 }
  0x7c   : > { %443 = vmatprep.mubr.bf16.mxu0 %v1986_v0 }
  0x7e   : > { %v311_v8 = vpop.trf.xlu0 }
  0x82   : > { %v312_v9 = vpop.trf.xlu0 }
  0x83   : > { %1523 = vmatmul.mubr.msk.bf16.gmra.mxu0 %vm342_vm0, %v310_v7 }
  0x84   : > { %453 = vmatprep.mubr.bf16.mxu0 %v1986_v0 }
  0x86   : > { %v313_v10 = vpop.trf.xlu0 }
  0x8a   : > { %v314_v11 = vpop.trf.xlu0 }
  0x8b   : > { %1524 = vmatmul.mubr.msk.bf16.gmra.mxu0 %vm342_vm0, %v311_v8 }
  0x8c   : > { %463 = vmatprep.mubr.bf16.mxu0 %v1986_v0 }
  0x8e   : > { %v315_v12 = vpop.trf.xlu0 }
  0x92   : > { %v324_v13 = vpop.trf.xlu0 }
  0x93   : > { %1525 = vmatmul.mubr.msk.bf16.gmra.mxu0 %vm342_vm0, %v312_v9  ;;  %1529 = vmatmul.mubr.msk.bf16.vlgmr.msra.gmra.mxu1 %vm342_vm0, %v324_v13 }
  0x94   : > { %473 = vmatprep.mubr.bf16.mxu0 %v1986_v0  ;;  %513 = vmatprep.mubr.bf16.mxu1 %v1986_v0 }
  0x96   : > { %v325_v14 = vpop.trf.xlu0 }
  0x9a   : > { %v326_v15 = vpop.trf.xlu0 }
  0x9b   : > { %1526 = vmatmul.mubr.msk.bf16.gmra.mxu0 %vm342_vm0, %v313_v10  ;;  %1530 = vmatmul.mubr.msk.bf16.gmra.mxu1 %vm342_vm0, %v325_v14 }
  0x9c   : > { %483 = vmatprep.mubr.bf16.mxu0 %v1986_v0  ;;  %523 = vmatprep.mubr.bf16.mxu1 %v1986_v0 }
  0x9e   : > { %v327_v16 = vpop.trf.xlu0 }
  0xa2   : > { %v328_v17 = vpop.trf.xlu0 }
  0xa3   : > { %1527 = vmatmul.mubr.msk.bf16.gmra.mxu0 %vm342_vm0, %v314_v11  ;;  %1531 = vmatmul.mubr.msk.bf16.gmra.mxu1 %vm342_vm0, %v326_v15 }
  0xa4   : > { %493 = vmatprep.mubr.bf16.mxu0 %v1986_v0  ;;  %533 = vmatprep.mubr.bf16.mxu1 %v1986_v0 }
  0xa6   : > { %v329_v18 = vpop.trf.xlu0 }
  0xaa   : > { %v330_v19 = vpop.trf.xlu0 }
  0xab   : > { %1528 = vmatmul.mubr.msk.bf16.gmra.mxu0 %vm342_vm0, %v315_v12  ;;  %1532 = vmatmul.mubr.msk.bf16.gmra.mxu1 %vm342_vm0, %v327_v16 }
  0xac   : > { %543 = vmatprep.mubr.bf16.mxu1 %v1986_v0 }
  0xae   : > { %v331_v20 = vpop.trf.xlu0 }
  0xb3   : > { %1533 = vmatmul.mubr.msk.bf16.gmra.mxu1 %vm342_vm0, %v328_v17 }
  0xb4   : > { %553 = vmatprep.mubr.bf16.mxu1 %v1986_v0 }
  0xbb   : > { %1534 = vmatmul.mubr.msk.bf16.gmra.mxu1 %vm342_vm0, %v329_v18 }
  0xbc   : > { %563 = vmatprep.mubr.bf16.mxu1 %v1986_v0 }
  0xc3   : > { %1535 = vmatmul.mubr.msk.bf16.gmra.mxu1 %vm342_vm0, %v330_v19 }
  0xc4   : > { %573 = vmatprep.mubr.bf16.mxu1 %v1986_v0 }
  0xcb   : > { %1536 = vmatmul.mubr.msk.bf16.gmra.mxu1 %vm342_vm0, %v331_v20 }
 0x133   : > { %v425_v21 = vpop.f32.mrf.mxu0 }
 0x134   : > { %v1537_v22 = vmul.f32 0.25, %v425_v21 }
 0x135   : > { %v427_v23 = vpop.f32.mrf.mxu0 }
 0x136   : > { %v712_v24 = vmul.f32 1.442695, %v1537_v22  ;;  %v1538_v25 = vmul.f32 0.25, %v427_v23 }
 0x137   : > { %v429_v26 = vpop.f32.mrf.mxu0 }
 0x138   : > { %1706 = vpow2.f32 %v712_v24  ;;  %v714_v27 = vmul.f32 1.442695, %v1538_v25  ;;  %v1539_v28 = vmul.f32 0.25, %v429_v26 }
 0x139   : > { %v431_v29 = vpop.f32.mrf.mxu0 }
 0x13a   : > { %1708 = vpow2.f32 %v714_v27  ;;  %v716_v30 = vmul.f32 1.442695, %v1539_v28  ;;  %v1540_v31 = vmul.f32 0.25, %v431_v29 }
 0x13b   : > { %v435_v32 = vpop.f32.mrf.mxu0 }
 0x13c   : > { %1710 = vpow2.f32 %v716_v30  ;;  %v718_v33 = vmul.f32 1.442695, %v1540_v31  ;;  %v1541_v34 = vmul.f32 0.25, %v435_v32 }
 0x13d   : > { %v437_v35 = vpop.f32.mrf.mxu0 }
 0x13e   : > { %1712 = vpow2.f32 %v718_v33  ;;  %v720_v36 = vmul.f32 1.442695, %v1541_v34  ;;  %v1542_v37 = vmul.f32 0.25, %v437_v35 }
 0x13f   : > { %v439_v38 = vpop.f32.mrf.mxu0 }
 0x140   : > { %1714 = vpow2.f32 %v720_v36  ;;  %v722_v39 = vmul.f32 1.442695, %v1542_v37  ;;  %v1543_v40 = vmul.f32 0.25, %v439_v38 }
 0x141   : > { %v441_v41 = vpop.f32.mrf.mxu0 }
 0x142   : > { %1716 = vpow2.f32 %v722_v39  ;;  %v724_v42 = vmul.f32 1.442695, %v1543_v40  ;;  %v1544_v43 = vmul.f32 0.25, %v441_v41 }
 0x143   : > { %v445_v44 = vpop.f32.mrf.mxu0 }
 0x144   : > { %1718 = vpow2.f32 %v724_v42  ;;  %v726_v45 = vmul.f32 1.442695, %v1544_v43  ;;  %v1545_v46 = vmul.f32 0.25, %v445_v44 }
 0x145   : > { %v1707_v47 = vpop.eup %1706  ;;  %v447_v48 = vpop.f32.mrf.mxu0 }
 0x146   : > { %v840_v49 = vadd.f32 1.0, %v1707_v47  ;;  %1720 = vpow2.f32 %v726_v45  ;;  %v728_v50 = vmul.f32 1.442695, %v1545_v46  ;;  %v1546_v51 = vmul.f32 0.25, %v447_v48 }
 0x147   : > { %v1709_v52 = vpop.eup %1708  ;;  %v449_v53 = vpop.f32.mrf.mxu0 }
 0x148   : > { %1722 = vrcp.f32 %v840_v49  ;;  %v841_v54 = vadd.f32 1.0, %v1709_v52  ;;  %v730_v55 = vmul.f32 1.442695, %v1546_v51  ;;  %v1547_v56 = vmul.f32 0.25, %v449_v53 }
 0x149   : > { %v1711_v57 = vpop.eup %1710  ;;  %1724 = vpow2.f32 %v728_v50  ;;  %v451_v58 = vpop.f32.mrf.mxu0 }
 0x14a   : > { %1726 = vrcp.f32 %v841_v54  ;;  %v842_v59 = vadd.f32 1.0, %v1711_v57  ;;  %v732_v60 = vmul.f32 1.442695, %v1547_v56  ;;  %v1548_v61 = vmul.f32 0.25, %v451_v58 }
 0x14b   : > { %v1713_v62 = vpop.eup %1712  ;;  %1728 = vpow2.f32 %v730_v55  ;;  %v455_v63 = vpop.f32.mrf.mxu0 }
 0x14c   : > { %1730 = vrcp.f32 %v842_v59  ;;  %v843_v0 = vadd.f32 1.0, %v1713_v62  ;;  %v734_v1 = vmul.f32 1.442695, %v1548_v61  ;;  %v1549_v2 = vmul.f32 0.25, %v455_v63 }
 0x14d   : > { %v1715_v3 = vpop.eup %1714  ;;  %1732 = vpow2.f32 %v732_v60  ;;  %v457_v4 = vpop.f32.mrf.mxu0 }
 0x14e   : > { %1734 = vrcp.f32 %v843_v0  ;;  %v844_v5 = vadd.f32 1.0, %v1715_v3  ;;  %v736_v6 = vmul.f32 1.442695, %v1549_v2  ;;  %v1550_v7 = vmul.f32 0.25, %v457_v4 }
 0x14f   : > { %v1717_v8 = vpop.eup %1716  ;;  %1736 = vpow2.f32 %v734_v1  ;;  %v459_v9 = vpop.f32.mrf.mxu0 }
 0x150   : > { %1738 = vrcp.f32 %v844_v5  ;;  %v845_v10 = vadd.f32 1.0, %v1717_v8  ;;  %v738_v11 = vmul.f32 1.442695, %v1550_v7  ;;  %v1551_v12 = vmul.f32 0.25, %v459_v9 }
 0x151   : > { %v1719_v13 = vpop.eup %1718  ;;  %1740 = vpow2.f32 %v736_v6  ;;  %v461_v14 = vpop.f32.mrf.mxu0 }
 0x152   : > { %1742 = vrcp.f32 %v845_v10  ;;  %v846_v15 = vadd.f32 1.0, %v1719_v13  ;;  %v740_v16 = vmul.f32 1.442695, %v1551_v12  ;;  %v1552_v17 = vmul.f32 0.25, %v461_v14 }
 0x153   : > { %v1721_v18 = vpop.eup %1720  ;;  %1744 = vpow2.f32 %v738_v11  ;;  %v465_v19 = vpop.f32.mrf.mxu0 }
 0x154   : > { %v505_v20 = vpop.f32.mrf.mxu1  ;;  %1746 = vrcp.f32 %v846_v15  ;;  %v847_v21 = vadd.f32 1.0, %v1721_v18  ;;  %v742_v22 = vmul.f32 1.442695, %v1552_v17  ;;  %v1553_v23 = vmul.f32 0.25, %v465_v19 }
 0x155   : > { %v2051_v24 = vpop.eup %1722  ;;  %1748 = vpow2.f32 %v740_v16  ;;  %v1569_v25 = vmul.f32 0.25, %v505_v20  ;;  %v467_v26 = vpop.f32.mrf.mxu0 }
 0x156   : > { %v507_v27 = vpop.f32.mrf.mxu1  ;;  %v1725_v28 = vpop.eup %1724  ;;  %1750 = vrcp.f32 %v847_v21  ;;  %v744_v29 = vmul.f32 1.442695, %v1553_v23  ;;  %v1554_v30 = vmul.f32 0.25, %v467_v26 }
 0x157   : > { %v1570_v31 = vmul.f32 0.25, %v507_v27  ;;  %v2053_v32 = vpop.eup %1726  ;;  %v848_v33 = vadd.f32 1.0, %v1725_v28  ;;  %1752 = vpow2.f32 %v742_v22  ;;  %v776_v34 = vmul.f32 1.442695, %v1569_v25  ;;  %v469_v35 = vpop.f32.mrf.mxu0 }
 0x158   : > { %v509_v36 = vpop.f32.mrf.mxu1  ;;  %v1729_v37 = vpop.eup %1728  ;;  %v1638_v38 = vpack.c.bf16 %v2053_v32, %v2051_v24  ;;  %1754 = vpow2.f32 %v744_v29  ;;  %v746_v39 = vmul.f32 1.442695, %v1554_v30  ;;  %v1555_v42 = vmul.f32 0.25, %v469_v35 }
 0x159   : > { %v2062_v40 = vpop.eup %1730  ;;  %1756 = vrcp.f32 %v848_v33  ;;  %v849_v41 = vadd.f32 1.0, %v1729_v37  ;;  %v471_v43 = vpop.f32.mrf.mxu0  ;;  %v778_v46 = vmul.f32 1.442695, %v1570_v31  ;;  %v1571_v47 = vmul.f32 0.25, %v509_v36 }
 0x15a   : > { %v511_v44 = vpop.f32.mrf.mxu1  ;;  %v1733_v45 = vpop.eup %1732  ;;  %1224 = vst [vmem:[%s2058_s26] sm:$0xff] %v1638_v38  ;;  %1758 = vpow2.f32 %v776_v34  ;;  %v748_v53 = vmul.f32 1.442695, %v1555_v42  ;;  %v1556_v54 = vmul.f32 0.25, %v471_v43 }
 0x15b   : > { %v2065_v48 = vpop.eup %1734  ;;  %1760 = vrcp.f32 %v849_v41  ;;  %v850_v49 = vadd.f32 1.0, %v1733_v45  ;;  %v475_v57 = vpop.f32.mrf.mxu0  ;;  %v780_v61 = vmul.f32 1.442695, %v1571_v47  ;;  %v1572_v62 = vmul.f32 0.25, %v511_v44 }
 0x15c   : > { %v515_v50 = vpop.f32.mrf.mxu1  ;;  %v1737_v51 = vpop.eup %1736  ;;  %v1639_v52 = vpack.c.bf16 %v2065_v48, %v2062_v40  ;;  %1762 = vpow2.f32 %v746_v39  ;;  %v750_v5 = vmul.f32 1.442695, %v1556_v54  ;;  %v1557_v8 = vmul.f32 0.25, %v475_v57 }
 0x15d   : > { %v1739_v55 = vpop.eup %1738  ;;  %1764 = vrcp.f32 %v850_v49  ;;  %v851_v56 = vadd.f32 1.0, %v1737_v51  ;;  %v477_v9 = vpop.f32.mrf.mxu0  ;;  %v782_v13 = vmul.f32 1.442695, %v1572_v62  ;;  %v1573_v16 = vmul.f32 0.25, %v515_v50 }
 0x15e   : > { %v517_v58 = vpop.f32.mrf.mxu1  ;;  %v1741_v59 = vpop.eup %1740  ;;  %1225 = vst [vmem:[%s2058_s26 + $0x8] sm:$0xff] %v1639_v52  ;;  %v1256_v60 = vmax.f32 %v2051_v24, %v1739_v55  ;;  %1766 = vpow2.f32 %v778_v46  ;;  %v1558_v21 = vmul.f32 0.25, %v477_v9  ;;  %v752_v24 = vmul.f32 1.442695, %v1557_v8 }
 0x15f   : > { %v1743_v63 = vpop.eup %1742  ;;  %1768 = vrcp.f32 %v851_v56  ;;  %v852_v0 = vadd.f32 1.0, %v1741_v59  ;;  %v479_v25 = vpop.f32.mrf.mxu0  ;;  %v784_v31 = vmul.f32 1.442695, %v1573_v16 }
 0x160   : > { %v519_v1 = vpop.f32.mrf.mxu1  ;;  %v1745_v2 = vpop.eup %1744  ;;  %v1640_v3 = vpack.c.bf16 %v1743_v63, %v1739_v55  ;;  %v1257_v4 = vmax.f32 %v2053_v32, %v1743_v63  ;;  %1770 = vpow2.f32 %v748_v53  ;;  %v1574_v32 = vmul.f32 0.25, %v517_v58 }
 0x161   : > { %v1747_v6 = vpop.eup %1746  ;;  %1772 = vrcp.f32 %v852_v0  ;;  %v853_v7 = vadd.f32 1.0, %v1745_v2  ;;  %v754_v36 = vmul.f32 1.442695, %v1558_v21  ;;  %v481_v41 = vpop.f32.mrf.mxu0 }
 0x162   : > { %v2072_v10 = vpop.f32.mrf.mxu1  ;;  %v1749_v11 = vpop.eup %1748  ;;  %1226 = vst [vmem:[%s2058_s26 + $0x10] sm:$0xff] %v1640_v3  ;;  %v1258_v12 = vmax.f32 %v2062_v40, %v1747_v6  ;;  %1774 = vpow2.f32 %v780_v61  ;;  %v1559_v40 = vmul.f32 0.25, %v479_v25  ;;  %v786_v47 = vmul.f32 1.442695, %v1574_v32 }
 0x163   : > { %v1751_v14 = vpop.eup %1750  ;;  %1776 = vrcp.f32 %v853_v7  ;;  %v854_v15 = vadd.f32 1.0, %v1749_v11  ;;  %v1560_v52 = vmul.f32 0.25, %v481_v41  ;;  %v485_v57 = vpop.f32.mrf.mxu0  ;;  %v1576_v63 = vmul.f32 0.25, %v2072_v10 }
 0x164   : > { %v2076_v17 = vpop.f32.mrf.mxu1  ;;  %v1753_v18 = vpop.eup %1752  ;;  %v1641_v19 = vpack.c.bf16 %v1751_v14, %v1747_v6  ;;  %v1259_v20 = vmax.f32 %v2065_v48, %v1751_v14  ;;  %1778 = vpow2.f32 %v750_v5  ;;  %v1575_v48 = vmul.f32 0.25, %v519_v1 }
 0x165   : > { %v1755_v22 = vpop.eup %1754  ;;  %1780 = vrcp.f32 %v854_v15  ;;  %v855_v23 = vadd.f32 1.0, %v1753_v18  ;;  %v756_v56 = vmul.f32 1.442695, %v1559_v40  ;;  %v1561_v3 = vmul.f32 0.25, %v485_v57  ;;  %v487_v7 = vpop.f32.mrf.mxu0 }
 0x166   : > { %v2079_v26 = vpop.f32.mrf.mxu1  ;;  %v1757_v27 = vpop.eup %1756  ;;  %1227 = vst [vmem:[%s2058_s26 + $0x18] sm:$0xff] %v1641_v19  ;;  %v856_v28 = vadd.f32 1.0, %v1755_v22  ;;  %1782 = vpow2.f32 %v782_v13  ;;  %v788_v62 = vmul.f32 1.442695, %v1575_v48  ;;  %v758_v6 = vmul.f32 1.442695, %v1560_v52 }
 0x167   : > { %v1759_v29 = vpop.eup %1758  ;;  %v2082_v30 = vmax.f32 %v1256_v60, %v1757_v27  ;;  %1784 = vrcp.f32 %v855_v23  ;;  %v1577_v11 = vmul.f32 0.25, %v2076_v17  ;;  %v790_v13 = vmul.f32 1.442695, %v1576_v63  ;;  %v489_v22 = vpop.f32.mrf.mxu0 }
 0x168   : > { %v2084_v33 = vpop.f32.mrf.mxu1  ;;  %v1761_v34 = vpop.eup %1760  ;;  %1786 = vrcp.f32 %v856_v28  ;;  %v872_v35 = vadd.f32 1.0, %v1759_v29  ;;  %v760_v18 = vmul.f32 1.442695, %v1561_v3  ;;  %v1562_v19 = vmul.f32 0.25, %v487_v7 }
 0x169   : > { %v1763_v37 = vpop.eup %1762  ;;  %v1642_v38 = vpack.c.bf16 %v1761_v34, %v1757_v27  ;;  %v2086_v39 = vmax.f32 %v1257_v4, %v1761_v34  ;;  %1788 = vpow2.f32 %v752_v24  ;;  %v792_v25 = vmul.f32 1.442695, %v1577_v11 }
 0x16a   : > { %v2088_v42 = vpop.f32.mrf.mxu1  ;;  %v1765_v43 = vpop.eup %1764  ;;  %1790 = vrcp.f32 %v872_v35  ;;  %v857_v44 = vadd.f32 1.0, %v1763_v37  ;;  %v1578_v27 = vmul.f32 0.25, %v2079_v26  ;;  %v762_v34 = vmul.f32 1.442695, %v1562_v19 }
 0x16b   : > { %v1767_v45 = vpop.eup %1766  ;;  %1228 = vst [vmem:[%s2058_s26 + $0x20] sm:$0xff] %v1642_v38  ;;  %v2091_v46 = vmax.f32 %v1258_v12, %v1765_v43  ;;  %1792 = vpow2.f32 %v784_v31  ;;  %v1563_v35 = vmul.f32 0.25, %v489_v22  ;;  %v491_v38 = vpop.f32.mrf.mxu0 }
 0x16c   : > { %v2093_v49 = vpop.f32.mrf.mxu1  ;;  %v1769_v50 = vpop.eup %1768  ;;  %1794 = vrcp.f32 %v857_v44  ;;  %v873_v51 = vadd.f32 1.0, %v1767_v45  ;;  %v794_v41 = vmul.f32 1.442695, %v1578_v27  ;;  %v1564_v52 = vmul.f32 0.25, %v491_v38 }
 0x16d   : > { %v1771_v53 = vpop.eup %1770  ;;  %v1643_v54 = vpack.c.bf16 %v1769_v50, %v1765_v43  ;;  %v2095_v55 = vmax.f32 %v1259_v20, %v1769_v50  ;;  %1796 = vpow2.f32 %v754_v36  ;;  %v1579_v43 = vmul.f32 0.25, %v2084_v33 }
 0x16e   : > { %v2097_v58 = vpop.f32.mrf.mxu1  ;;  %v2099_v59 = vpop.eup %1772  ;;  %1798 = vrcp.f32 %v873_v51  ;;  %v858_v60 = vadd.f32 1.0, %v1771_v53  ;;  %v764_v51 = vmul.f32 1.442695, %v1563_v35  ;;  %v1580_v33 = vmul.f32 0.25, %v2088_v42 }
 0x16f   : > { %v1775_v61 = vpop.eup %1774  ;;  %1229 = vst [vmem:[%s2058_s26 + $0x28] sm:$0xff] %v1643_v54  ;;  %1800 = vpow2.f32 %v786_v47  ;;  %v796_v57 = vmul.f32 1.442695, %v1579_v43  ;;  %v1581_v19 = vmul.f32 0.25, %v2093_v49  ;;  %v1582_v35 = vmul.f32 0.25, %v2097_v58 }
 0x170   : > { %v2103_v0 = vpop.f32.mrf.mxu1  ;;  %v2105_v1 = vpop.eup %1776  ;;  %1802 = vrcp.f32 %v858_v60  ;;  %v874_v2 = vadd.f32 1.0, %v1775_v61  ;;  %v798_v11 = vmul.f32 1.442695, %v1580_v33 }
 0x171   : > { %v1779_v4 = vpop.eup %1778  ;;  %v1644_v5 = vpack.c.bf16 %v2105_v1, %v2099_v59  ;;  %1804 = vpow2.f32 %v756_v56  ;;  %v495_v60 = vpop.f32.mrf.mxu0  ;;  %v802_v58 = vmul.f32 1.442695, %v1582_v35  ;;  %v1583_v33 = vmul.f32 0.25, %v2103_v0 }
 0x172   : > { %v2109_v8 = vpop.f32.mrf.mxu1  ;;  %v2111_v9 = vpop.eup %1780  ;;  %1806 = vrcp.f32 %v874_v2  ;;  %v859_v10 = vadd.f32 1.0, %v1779_v4  ;;  %v766_v4 = vmul.f32 1.442695, %v1564_v52  ;;  %v1565_v7 = vmul.f32 0.25, %v495_v60 }
 0x173   : > { %v1783_v12 = vpop.eup %1782  ;;  %1230 = vst [vmem:[%s2058_s26 + $0x30] sm:$0xff] %v1644_v5  ;;  %1808 = vpow2.f32 %v788_v62  ;;  %v804_v0 = vmul.f32 1.442695, %v1583_v33 }
 0x174   : > { %v2115_v14 = vpop.f32.mrf.mxu1  ;;  %v2117_v15 = vpop.eup %1784  ;;  %1810 = vrcp.f32 %v859_v10  ;;  %v875_v16 = vadd.f32 1.0, %v1783_v12 }
 0x175   : > { %v2119_v20 = vpop.eup %1786  ;;  %v1645_v21 = vpack.c.bf16 %v2117_v15, %v2111_v9  ;;  %v1267_v17 = vmax.f32 %v2095_v55, %v2117_v15  ;;  %1812 = vpow2.f32 %v758_v6  ;;  %v497_v12 = vpop.f32.mrf.mxu0 }
 0x176   : > { %v2125_v23 = vpop.f32.mrf.mxu1  ;;  %v1789_v24 = vpop.eup %1788  ;;  %1814 = vrcp.f32 %v875_v16 }
 0x177   : > { %v1791_v28 = vpop.eup %1790  ;;  %1231 = vst [vmem:[%s2058_s26 + $0x38] sm:$0xff] %v1645_v21  ;;  %v860_v29 = vadd.f32 1.0, %v1789_v24  ;;  %1816 = vpow2.f32 %v790_v13 }
 0x178   : > { %v2129_v31 = vpop.f32.mrf.mxu1  ;;  %v1793_v32 = vpop.eup %1792  ;;  %1818 = vpow2.f32 %v760_v18 }
 0x179   : > { %v2131_v36 = vpop.eup %1794  ;;  %1820 = vrcp.f32 %v860_v29  ;;  %v876_v37 = vadd.f32 1.0, %v1793_v32  ;;  %v1566_v29 = vmul.f32 0.25, %v497_v12  ;;  %v1584_v12 = vmul.f32 0.25, %v2109_v8 }
 0x17a   : > { %v1797_v40 = vpop.eup %1796  ;;  %v1646_v26 = vpack.c.bf16 %v2131_v36, %v2119_v20  ;;  %1822 = vpow2.f32 %v792_v25  ;;  %v2136_v47 = vpop.f32.mrf.mxu1 }
 0x17b   : > { %v1799_v44 = vpop.eup %1798  ;;  %1824 = vrcp.f32 %v876_v37  ;;  %v861_v45 = vadd.f32 1.0, %v1797_v40  ;;  %v499_v37 = vpop.f32.mrf.mxu0  ;;  %v800_v40 = vmul.f32 1.442695, %v1581_v19  ;;  %v1585_v19 = vmul.f32 0.25, %v2115_v14 }
 0x17c   : > { %v1801_v48 = vpop.eup %1800  ;;  %1232 = vst [vmem:[%s2058_s26 + $0x40] sm:$0xff] %v1646_v26  ;;  %v1654_v50 = vpack.c.bf16 %v1799_v44, %v1791_v28  ;;  %1826 = vpow2.f32 %v762_v34  ;;  %v1284_v62 = vmax.f32 %v1799_v44, %v1791_v28  ;;  %v2143_v2 = vpop.f32.mrf.mxu1  ;;  %v768_v28 = vmul.f32 1.442695, %v1565_v7 }
 0x17d   : > { %v2139_v53 = vpop.eup %1802  ;;  %1828 = vrcp.f32 %v861_v45  ;;  %v877_v54 = vadd.f32 1.0, %v1801_v48  ;;  %v770_v45 = vmul.f32 1.442695, %v1566_v29  ;;  %v1567_v48 = vmul.f32 0.25, %v499_v37  ;;  %v501_v52 = vpop.f32.mrf.mxu0 }
 0x17e   : > { %v1805_v56 = vpop.eup %1804  ;;  %1240 = vst [vmem:[%s2058_s26 + $0x80] sm:$0xff] %v1654_v50  ;;  %1830 = vpow2.f32 %v794_v41  ;;  %v2150_v21 = vpop.f32.mrf.mxu1  ;;  %v806_v35 = vmul.f32 1.442695, %v1584_v12 }
 0x17f   : > { %v1807_v61 = vpop.eup %1806  ;;  %1832 = vrcp.f32 %v877_v54  ;;  %v862_v63 = vadd.f32 1.0, %v1805_v56 }
 0x180   : > { %v1809_v3 = vpop.eup %1808  ;;  %1834 = vpow2.f32 %v764_v51  ;;  %v1285_v16 = vmax.f32 %v1807_v61, %v1284_v62  ;;  %v2157_v26 = vpop.f32.mrf.mxu1 }
 0x181   : > { %v2145_v5 = vpop.eup %1810  ;;  %1836 = vrcp.f32 %v862_v63  ;;  %v878_v6 = vadd.f32 1.0, %v1809_v3 }
 0x182   : > { %v1813_v10 = vpop.eup %1812  ;;  %v1647_v42 = vpack.c.bf16 %v2145_v5, %v2139_v53  ;;  %1838 = vpow2.f32 %v796_v57  ;;  %v2164_v60 = vpop.f32.mrf.mxu1 }
 0x183   : > { %v1815_v13 = vpop.eup %1814  ;;  %1840 = vrcp.f32 %v878_v6  ;;  %v863_v18 = vadd.f32 1.0, %v1813_v10  ;;  %v1568_v6 = vmul.f32 0.25, %v501_v52 }
 0x184   : > { %v1817_v22 = vpop.eup %1816  ;;  %1233 = vst [vmem:[%s2058_s26 + $0x48] sm:$0xff] %v1647_v42  ;;  %v1655_v24 = vpack.c.bf16 %v1815_v13, %v1807_v61  ;;  %1842 = vpow2.f32 %v766_v4  ;;  %v1286_v38 = vmax.f32 %v1815_v13, %v1285_v16  ;;  %v772_v4 = vmul.f32 1.442695, %v1567_v48  ;;  %v2171_v13 = vpop.f32.mrf.mxu1 }
 0x185   : > { %v1819_v25 = vpop.eup %1818  ;;  %1844 = vrcp.f32 %v863_v18  ;;  %v879_v27 = vadd.f32 1.0, %v1817_v22 }
 0x186   : > { %v2153_v32 = vpop.eup %1820  ;;  %1241 = vst [vmem:[%s2058_s26 + $0x88] sm:$0xff] %v1655_v24  ;;  %v864_v34 = vadd.f32 1.0, %v1819_v25  ;;  %1846 = vpow2.f32 %v798_v11  ;;  %v774_v24 = vmul.f32 1.442695, %v1568_v6  ;;  %v2179_v37 = vpop.f32.mrf.mxu1 }
 0x187   : > { %v1823_v49 = vpop.eup %1822  ;;  %1848 = vrcp.f32 %v879_v27 }
 0x188   : > { %v1825_v41 = vpop.eup %1824  ;;  %1850 = vrcp.f32 %v864_v34  ;;  %v880_v43 = vadd.f32 1.0, %v1823_v49  ;;  %v2187_v52 = vpop.f32.mrf.mxu1 }
 0x189   : > { %v1827_v44 = vpop.eup %1826  ;;  %1852 = vpow2.f32 %v768_v28  ;;  %v1287_v56 = vmax.f32 %v1825_v41, %v1286_v38  ;;  %v1586_v28 = vmul.f32 0.25, %v2125_v23  ;;  %v808_v38 = vmul.f32 1.442695, %v1585_v19 }
 0x18a   : > { %v2159_v50 = vpop.eup %1828  ;;  %1854 = vrcp.f32 %v880_v43  ;;  %v865_v51 = vadd.f32 1.0, %v1827_v44  ;;  %v1265_v19 = vmax.f32 %v2086_v39, %v2105_v1  ;;  %v1593_v39 = vmul.f32 0.25, %v2171_v13 }
 0x18b   : > { %v1831_v54 = vpop.eup %1830  ;;  %v1648_v57 = vpack.c.bf16 %v2159_v50, %v2153_v32  ;;  %1856 = vpow2.f32 %v800_v40  ;;  %v1587_v40 = vmul.f32 0.25, %v2129_v31  ;;  %v810_v44 = vmul.f32 1.442695, %v1586_v28 }
 0x18c   : > { %v1833_v61 = vpop.eup %1832  ;;  %1858 = vrcp.f32 %v865_v51  ;;  %v881_v62 = vadd.f32 1.0, %v1831_v54 }
 0x18d   : > { %v1835_v63 = vpop.eup %1834  ;;  %1234 = vst [vmem:[%s2058_s26 + $0x50] sm:$0xff] %v1648_v57  ;;  %v1656_v3 = vpack.c.bf16 %v1833_v61, %v1825_v41  ;;  %1860 = vpow2.f32 %v770_v45  ;;  %v1288_v11 = vmax.f32 %v1833_v61, %v1287_v56  ;;  %v1588_v45 = vmul.f32 0.25, %v2136_v47 }
 0x18e   : > { %v2167_v7 = vpop.eup %1836  ;;  %1862 = vrcp.f32 %v881_v62  ;;  %v866_v10 = vadd.f32 1.0, %v1835_v63  ;;  %v812_v31 = vmul.f32 1.442695, %v1587_v40  ;;  %v1589_v56 = vmul.f32 0.25, %v2143_v2 }
 0x18f   : > { %v1839_v42 = vpop.eup %1838  ;;  %1242 = vst [vmem:[%s2058_s26 + $0x90] sm:$0xff] %v1656_v3  ;;  %1864 = vpow2.f32 %v802_v58  ;;  %v814_v62 = vmul.f32 1.442695, %v1588_v45  ;;  %v1590_v63 = vmul.f32 0.25, %v2150_v21  ;;  %v1595_v45 = vmul.f32 0.25, %v2187_v52 }
 0x190   : > { %v1841_v16 = vpop.eup %1840  ;;  %1866 = vrcp.f32 %v866_v10  ;;  %v882_v18 = vadd.f32 1.0, %v1839_v42  ;;  %v571_v10 = vpop.f32.mrf.mxu1 }
 0x191   : > { %v1843_v22 = vpop.eup %1842  ;;  %1868 = vpow2.f32 %v772_v4  ;;  %v1289_v34 = vmax.f32 %v1841_v16, %v1288_v11  ;;  %v816_v11 = vmul.f32 1.442695, %v1589_v56 }
 0x192   : > { %v2174_v25 = vpop.eup %1844  ;;  %1870 = vrcp.f32 %v882_v18  ;;  %v867_v27 = vadd.f32 1.0, %v1843_v22  ;;  %v818_v22 = vmul.f32 1.442695, %v1590_v63 }
 0x193   : > { %v1847_v29 = vpop.eup %1846  ;;  %v1649_v8 = vpack.c.bf16 %v2174_v25, %v2167_v7  ;;  %1872 = vpow2.f32 %v804_v0  ;;  %v1591_v0 = vmul.f32 0.25, %v2157_v26  ;;  %v1266_v26 = vmax.f32 %v2091_v46, %v2111_v9 }
 0x194   : > { %v1849_v14 = vpop.eup %1848  ;;  %1874 = vrcp.f32 %v867_v27  ;;  %v883_v49 = vadd.f32 1.0, %v1847_v29 }
 0x195   : > { %v2182_v41 = vpop.eup %1850  ;;  %1235 = vst [vmem:[%s2058_s26 + $0x58] sm:$0xff] %v1649_v8  ;;  %v1657_v23 = vpack.c.bf16 %v1849_v14, %v1841_v16  ;;  %1876 = vpow2.f32 %v774_v24  ;;  %v1290_v51 = vmax.f32 %v1849_v14, %v1289_v34  ;;  %v1264_v16 = vmax.f32 %v2082_v30, %v2099_v59  ;;  %v575_v34 = vpop.f32.mrf.mxu1 }
 0x196   : > { %v1853_v43 = vpop.eup %1852  ;;  %1878 = vrcp.f32 %v883_v49  ;;  %v1592_v24 = vmul.f32 0.25, %v2164_v60  ;;  %v820_v8 = vmul.f32 1.442695, %v1591_v0  ;;  %v2213_v60 = vmax.f32 %v1266_v26, %v2139_v53 }
 0x197   : > { %v1855_v48 = vpop.eup %1854  ;;  %1243 = vst [vmem:[%s2058_s26 + $0x98] sm:$0xff] %v1657_v23  ;;  %v868_v58 = vadd.f32 1.0, %v1853_v43  ;;  %1880 = vpow2.f32 %v806_v35  ;;  %v1268_v59 = vmax.f32 %v1264_v16, %v2119_v20  ;;  %v1269_v35 = vmax.f32 %v1265_v19, %v2131_v36  ;;  %v577_v23 = vpop.f32.mrf.mxu1 }
 0x198   : > { %v1857_v54 = vpop.eup %1856  ;;  %1882 = vpow2.f32 %v808_v38  ;;  %v1291_v4 = vmax.f32 %v1855_v48, %v1290_v51  ;;  %v822_v20 = vmul.f32 1.442695, %v1592_v24  ;;  %v1594_v49 = vmul.f32 0.25, %v2179_v37 }
 0x199   : > { %v2190_v57 = vpop.eup %1858  ;;  %1884 = vrcp.f32 %v868_v58  ;;  %v884_v33 = vadd.f32 1.0, %v1857_v54  ;;  %v1272_v13 = vmax.f32 %v1268_v59, %v2153_v32  ;;  %v1596_v58 = vmul.f32 0.25, %v571_v10 }
 0x19a   : > { %v1861_v61 = vpop.eup %1860  ;;  %v1650_v47 = vpack.c.bf16 %v2190_v57, %v2182_v41  ;;  %1886 = vpow2.f32 %v810_v44  ;;  %v824_v44 = vmul.f32 1.442695, %v1593_v39  ;;  %v1271_v32 = vmax.f32 %v1267_v17, %v2145_v5 }
 0x19b   : > { %v1863_v3 = vpop.eup %1862  ;;  %1888 = vrcp.f32 %v884_v33  ;;  %v869_v6 = vadd.f32 1.0, %v1861_v61  ;;  %v1276_v51 = vmax.f32 %v1272_v13, %v2182_v41  ;;  %v826_v56 = vmul.f32 1.442695, %v1594_v49  ;;  %v579_v41 = vpop.f32.mrf.mxu1 }
 0x19c   : > { %v1865_v42 = vpop.eup %1864  ;;  %1236 = vst [vmem:[%s2058_s26 + $0x60] sm:$0xff] %v1650_v47  ;;  %v1658_v2 = vpack.c.bf16 %v1863_v3, %v1855_v48  ;;  %1890 = vpow2.f32 %v812_v31  ;;  %v1292_v28 = vmax.f32 %v1863_v3, %v1291_v4  ;;  %v1273_v61 = vmax.f32 %v1269_v35, %v2159_v50 }
 0x19d   : > { %v2197_v12 = vpop.eup %1866  ;;  %1892 = vrcp.f32 %v869_v6  ;;  %v885_v21 = vadd.f32 1.0, %v1865_v42  ;;  %v828_v3 = vmul.f32 1.442695, %v1595_v45  ;;  %v1597_v4 = vmul.f32 0.25, %v575_v34 }
 0x19e   : > { %v1869_v18 = vpop.eup %1868  ;;  %1244 = vst [vmem:[%s2058_s26 + $0xa0] sm:$0xff] %v1658_v2  ;;  %1894 = vpow2.f32 %v814_v62  ;;  %v1277_v55 = vmax.f32 %v1273_v61, %v2190_v57  ;;  %v830_v17 = vmul.f32 1.442695, %v1596_v58  ;;  %v1274_v10 = vmax.f32 %v2213_v60, %v2167_v7 }
 0x19f   : > { %v1871_v27 = vpop.eup %1870  ;;  %1896 = vrcp.f32 %v885_v21  ;;  %v870_v29 = vadd.f32 1.0, %v1869_v18  ;;  %v1598_v42 = vmul.f32 0.25, %v577_v23  ;;  %v581_v21 = vpop.f32.mrf.mxu1  ;;  %v832_v19 = vmul.f32 1.442695, %v1597_v4 }
 0x1a0   : > { %v1873_v30 = vpop.eup %1872  ;;  %1898 = vpow2.f32 %v816_v11  ;;  %v1293_v40 = vmax.f32 %v1871_v27, %v1292_v28 }
 0x1a1   : > { %v2209_v1 = vpop.eup %1874  ;;  %1900 = vrcp.f32 %v870_v29  ;;  %v886_v46 = vadd.f32 1.0, %v1873_v30  ;;  %v834_v34 = vmul.f32 1.442695, %v1598_v42  ;;  %v1600_v30 = vmul.f32 0.25, %v581_v21 }
 0x1a2   : > { %v1877_v9 = vpop.eup %1876  ;;  %v1651_v14 = vpack.c.bf16 %v2209_v1, %v2197_v12  ;;  %1902 = vpow2.f32 %v818_v22  ;;  %v1599_v22 = vmul.f32 0.25, %v579_v41 }
 0x1a3   : > { %v1879_v38 = vpop.eup %1878  ;;  %1904 = vrcp.f32 %v886_v46  ;;  %v871_v36 = vadd.f32 1.0, %v1877_v9  ;;  %v838_v13 = vmul.f32 1.442695, %v1600_v30 }
 0x1a4   : > { %v1881_v53 = vpop.eup %1880  ;;  %1237 = vst [vmem:[%s2058_s26 + $0x68] sm:$0xff] %v1651_v14  ;;  %v1659_v43 = vpack.c.bf16 %v1879_v38, %v1871_v27  ;;  %1906 = vpow2.f32 %v820_v8  ;;  %v1294_v52 = vmax.f32 %v1879_v38, %v1293_v40  ;;  %v1278_v27 = vmax.f32 %v1274_v10, %v2197_v12 }
 0x1a5   : > { %v1883_v48 = vpop.eup %1882  ;;  %1908 = vrcp.f32 %v871_v36  ;;  %v887_v37 = vadd.f32 1.0, %v1881_v53  ;;  %v1275_v8 = vmax.f32 %v1271_v32, %v2174_v25 }
 0x1a6   : > { %v1885_v54 = vpop.eup %1884  ;;  %1245 = vst [vmem:[%s2058_s26 + $0xa8] sm:$0xff] %v1659_v43  ;;  %v888_v31 = vadd.f32 1.0, %v1883_v48  ;;  %1910 = vpow2.f32 %v822_v20  ;;  %v836_v20 = vmul.f32 1.442695, %v1599_v22 }
 0x1a7   : > { %v1887_v33 = vpop.eup %1886  ;;  %v1280_v47 = vmax.f32 %v1276_v51, %v1885_v54  ;;  %1912 = vrcp.f32 %v887_v37  ;;  %v1279_v9 = vmax.f32 %v1275_v8, %v2209_v1 }
 0x1a8   : > { %v1889_v62 = vpop.eup %1888  ;;  %1914 = vrcp.f32 %v888_v31  ;;  %v889_v63 = vadd.f32 1.0, %v1887_v33 }
 0x1a9   : > { %v1891_v6 = vpop.eup %1890  ;;  %v1295_v15 = vmax.f32 %v1280_v47, %v1294_v52  ;;  %1916 = vpow2.f32 %v824_v44 }
 0x1aa   : > { %v1893_v5 = vpop.eup %1892  ;;  %1918 = vrcp.f32 %v889_v63  ;;  %v890_v50 = vadd.f32 1.0, %v1891_v6 }
 0x1ab   : > { %v1895_v2 = vpop.eup %1894  ;;  %v1296_v11 = vmax.f32 %v1295_v15, %v1889_v62  ;;  %v1652_v0 = vpack.c.bf16 %v1893_v5, %v1885_v54  ;;  %v1281_v16 = vmax.f32 %v1277_v55, %v1893_v5  ;;  %1920 = vpow2.f32 %v826_v56 }
 0x1ac   : > { %v1897_v18 = vpop.eup %1896  ;;  %1922 = vrcp.f32 %v890_v50  ;;  %v891_v57 = vadd.f32 1.0, %v1895_v2 }
 0x1ad   : > { %v1899_v24 = vpop.eup %1898  ;;  %1238 = vst [vmem:[%s2058_s26 + $0x70] sm:$0xff] %v1652_v0  ;;  %v1297_v7 = vmax.f32 %v1281_v16, %v1296_v11  ;;  %v1660_v26 = vpack.c.bf16 %v1897_v18, %v1889_v62  ;;  %1924 = vpow2.f32 %v828_v3 }
 0x1ae   : > { %v1901_v28 = vpop.eup %1900  ;;  %1926 = vrcp.f32 %v891_v57  ;;  %v892_v29 = vadd.f32 1.0, %v1899_v24 }
 0x1af   : > { %v1903_v59 = vpop.eup %1902  ;;  %v1298_v39 = vmax.f32 %v1897_v18, %v1297_v7  ;;  %1246 = vst [vmem:[%s2058_s26 + $0xb0] sm:$0xff] %v1660_v26  ;;  %v1282_v35 = vmax.f32 %v1278_v27, %v1901_v28  ;;  %1928 = vpow2.f32 %v830_v17 }
 0x1b0   : > { %v1905_v60 = vpop.eup %1904  ;;  %1930 = vrcp.f32 %v892_v29  ;;  %v893_v46 = vadd.f32 1.0, %v1903_v59 }
 0x1b1   : > { %v1907_v12 = vpop.eup %1906  ;;  %v1299_v14 = vmax.f32 %v1282_v35, %v1298_v39  ;;  %1932 = vpow2.f32 %v832_v19 }
 0x1b2   : > { %v1909_v49 = vpop.eup %1908  ;;  %1934 = vrcp.f32 %v893_v46  ;;  %v894_v38 = vadd.f32 1.0, %v1907_v12 }
 0x1b3   : > { %v1911_v40 = vpop.eup %1910  ;;  %v1300_v25 = vmax.f32 %v1905_v60, %v1299_v14  ;;  %v1653_v36 = vpack.c.bf16 %v1909_v49, %v1901_v28  ;;  %v1283_v23 = vmax.f32 %v1279_v9, %v1909_v49  ;;  %1936 = vpow2.f32 %v834_v34 }
 0x1b4   : > { %v1913_v53 = vpop.eup %1912  ;;  %1938 = vrcp.f32 %v894_v38  ;;  %v895_v43 = vadd.f32 1.0, %v1911_v40 }
 0x1b5   : > { %v1915_v44 = vpop.eup %1914  ;;  %1239 = vst [vmem:[%s2058_s26 + $0x78] sm:$0xff] %v1653_v36  ;;  %v1301_v1 = vmax.f32 %v1283_v23, %v1300_v25  ;;  %v1661_v45 = vpack.c.bf16 %v1913_v53, %v1905_v60  ;;  %1940 = vpow2.f32 %v836_v20 }
 0x1b6   : > { %v1917_v48 = vpop.eup %1916  ;;  %1942 = vrcp.f32 %v895_v43 }
 0x1b7   : > { %v1919_v51 = vpop.eup %1918  ;;  %v1302_v37 = vmax.f32 %v1913_v53, %v1301_v1  ;;  %1247 = vst [vmem:[%s2058_s26 + $0xb8] sm:$0xff] %v1661_v45  ;;  %v896_v58 = vadd.f32 1.0, %v1917_v48  ;;  %1944 = vpow2.f32 %v838_v13 }
 0x1b8   : > { %v1921_v54 = vpop.eup %1920  ;;  %v1662_v32 = vpack.c.bf16 %v1919_v51, %v1915_v44 }
 0x1b9   : > { %v1923_v31 = vpop.eup %1922  ;;  %v1303_v56 = vmax.f32 %v1915_v44, %v1302_v37  ;;  %1946 = vrcp.f32 %v896_v58  ;;  %v897_v33 = vadd.f32 1.0, %v1921_v54 }
 0x1ba   : > { %v1925_v61 = vpop.eup %1924  ;;  %1248 = vst [vmem:[%s2058_s26 + $0xc0] sm:$0xff] %v1662_v32 }
 0x1bb   : > { %v1927_v52 = vpop.eup %1926  ;;  %v1304_v47 = vmax.f32 %v1919_v51, %v1303_v56  ;;  %1948 = vrcp.f32 %v897_v33  ;;  %v898_v41 = vadd.f32 1.0, %v1925_v61 }
 0x1bc   : > { %v1929_v62 = vpop.eup %1928  ;;  %v1663_v63 = vpack.c.bf16 %v1927_v52, %v1923_v31 }
 0x1bd   : > { %v1931_v3 = vpop.eup %1930  ;;  %v1305_v4 = vmax.f32 %v1923_v31, %v1304_v47  ;;  %1950 = vrcp.f32 %v898_v41  ;;  %v899_v6 = vadd.f32 1.0, %v1929_v62 }
 0x1be   : > { %v1933_v55 = vpop.eup %1932  ;;  %1249 = vst [vmem:[%s2058_s26 + $0xc8] sm:$0xff] %v1663_v63 }
 0x1bf   : > { %v1935_v15 = vpop.eup %1934  ;;  %v1306_v17 = vmax.f32 %v1927_v52, %v1305_v4  ;;  %1952 = vrcp.f32 %v899_v6  ;;  %v900_v5 = vadd.f32 1.0, %v1933_v55 }
 0x1c0   : > { %v1937_v10 = vpop.eup %1936  ;;  %v1664_v50 = vpack.c.bf16 %v1935_v15, %v1931_v3 }
 0x1c1   : > { %v1939_v42 = vpop.eup %1938  ;;  %v1307_v2 = vmax.f32 %v1931_v3, %v1306_v17  ;;  %1954 = vrcp.f32 %v900_v5  ;;  %v901_v11 = vadd.f32 1.0, %v1937_v10 }
 0x1c2   : > { %v1941_v0 = vpop.eup %1940  ;;  %1250 = vst [vmem:[%s2058_s26 + $0xd0] sm:$0xff] %v1664_v50 }
 0x1c3   : > { %v1943_v16 = vpop.eup %1942  ;;  %v1308_v21 = vmax.f32 %v1935_v15, %v1307_v2  ;;  %1956 = vrcp.f32 %v901_v11  ;;  %v902_v18 = vadd.f32 1.0, %v1941_v0 }
 0x1c4   : > { %v1945_v57 = vpop.eup %1944  ;;  %v1665_v19 = vpack.c.bf16 %v1943_v16, %v1939_v42 }
 0x1c5   : > { %v1309_v22 = vmax.f32 %v1939_v42, %v1308_v21  ;;  %1958 = vrcp.f32 %v902_v18  ;;  %v903_v24 = vadd.f32 1.0, %v1945_v57 }
 0x1c6   : > { %v1947_v27 = vpop.eup %1946  ;;  %1251 = vst [vmem:[%s2058_s26 + $0xd8] sm:$0xff] %v1665_v19 }
 0x1c7   : > { %v1310_v7 = vmax.f32 %v1943_v16, %v1309_v22  ;;  %1960 = vrcp.f32 %v903_v24 }
 0x1c8   : > { %v1949_v26 = vpop.eup %1948 }
 0x1c9   : > { %v1311_v28 = vmax.f32 %v1947_v27, %v1310_v7  ;;  %v1666_v29 = vpack.c.bf16 %v1949_v26, %v1947_v27 }
 0x1ca   : > { %v1951_v34 = vpop.eup %1950 }
 0x1cb   : > { %v1312_v30 = vmax.f32 %v1949_v26, %v1311_v28  ;;  %1252 = vst [vmem:[%s2058_s26 + $0xe0] sm:$0xff] %v1666_v29 }
 0x1cc   : > { %v1953_v59 = vpop.eup %1952 }
 0x1cd   : > { %v1313_v8 = vmax.f32 %v1951_v34, %v1312_v30  ;;  %v1667_v39 = vpack.c.bf16 %v1953_v59, %v1951_v34 }
 0x1ce   : > { %v1955_v35 = vpop.eup %1954 }
 0x1cf   : > { %v1314_v60 = vmax.f32 %v1953_v59, %v1313_v8  ;;  %1253 = vst [vmem:[%s2058_s26 + $0xe8] sm:$0xff] %v1667_v39 }
 0x1d0   : > { %v1957_v46 = vpop.eup %1956 }
 0x1d1   : > { %v1315_v12 = vmax.f32 %v1955_v35, %v1314_v60  ;;  %v1668_v9 = vpack.c.bf16 %v1957_v46, %v1955_v35 }
 0x1d2   : > { %v1959_v14 = vpop.eup %1958 }
 0x1d3   : > { %v1316_v20 = vmax.f32 %v1957_v46, %v1315_v12  ;;  %1254 = vst [vmem:[%s2058_s26 + $0xf0] sm:$0xff] %v1668_v9 }
 0x1d4   : > { %v1961_v49 = vpop.eup %1960 }
 0x1d5   : > { %v1317_v38 = vmax.f32 %v1959_v14, %v1316_v20  ;;  %v1669_v13 = vpack.c.bf16 %v1961_v49, %v1959_v14 }
 0x1d7   : > { %v1318_v40 = vmax.f32 %v1961_v49, %v1317_v38  ;;  %1255 = vst [vmem:[%s2058_s26 + $0xf8] sm:$0xff] %v1669_v13 }
 0x1d9   : > { %1319 = vmax.xlane.f32.xlu1 %v1318_v40 }
 0x262   : > { %v1320_v25 = vpop.xlane.xlu1 %1319 }
 0x263   : > { %v1321_v36 = vrot.slane %v1320_v25, 4 }
 0x265   : > { %v1322_v23 = vmax.f32 %v1320_v25, %v1321_v36 }
 0x267   : > { %v1323_v53 = vrot.slane %v1322_v23, 2 }
 0x269   : > { %v1324_v43 = vmax.f32 %v1322_v23, %v1323_v53 }
 0x26b   : > { %v1325_v44 = vrot.slane %v1324_v43, 1 }
 0x26d   : > { %v1326_v1 = vmax.f32 %v1324_v43, %v1325_v44 }
 0x26f   : > { %1672 = vpush %v1326_v1 }
 0x2a0   : > { %s1673_s28 = spop %1672 }
 0x2a1   : > { %v1334_v45 = vstv %s1673_s28 }
 0x2a2   : > { %1336 = vst [vmem:[%s284_s4] sm:$0xff] %v1334_v45 }
 0x2a3 PF: > { %s14_s14 = sadd.s32 1, %s1984_s14   ;;  %s2263_s12 = smov %s1980_s13 }
 0x2a4   : > { %p11_p5 = scmp.ge.s32.totalorder %s14_s14, 4   ;;  %s2264_s13 = smov %s2266_s15 }
 0x2a6   :  { %13 = sbr.rel (!%p11_p5) target bundleno = 2 (0x2), region = 77 }

</bundles_post_ra>
